<compile_context>
chip_gen: v6e
topology: v6e:2x2x1
jax: 0.10.0
libtpu: 0.0.40
codegen_flags: <defaults>
</compile_context>

<pallas_src>
import functools

import jax
import jax.numpy as jnp
from jax.experimental import pallas as pl
from jax.experimental.pallas import tpu as pltpu


# ---------------------------------------------------------------------------
# kernel
# ---------------------------------------------------------------------------
def _block_kernel(x_ref, w_ref, g_ref, b_ref, m_ref, o_ref,
                  s1_ref, s2_ref, sc_ref, sh_ref, *,
                  KH, KW, Wp, TH, pw, eps, slope, inv_cnt):
    """One ConvDropoutNormReLU block; one halo'd spatial row tile per grid step.

    grid = (N, 2, T): pass 0 = conv + per-channel sum / sum-of-squares,
                      pass 1 = conv (recomputed) * scale + shift + LeakyReLU + store.

    x_ref : (1, Cin, R*Wp)     halo'd row tile, bf16, rows flattened with stride Wp
    w_ref : (Cout, KH*KW*Cin)  folded conv taps, bf16 (resident across the grid)
    g_ref : (Cout, 1) gamma f32   b_ref : (Cout, 1) beta f32 (resident)
    m_ref : (1, TH*Wp)         1.0 on valid output columns, 0.0 on Wp padding (resident)
    o_ref : (1, Cout, TH*Wp)   bf16 output tile in the next block's padded-column layout
    s1/s2/sc/sh : (Cout, 1) f32 VMEM scratch (stats / scale / shift), persist per sample
    """
    p = pl.program_id(1)
    t = pl.program_id(2)
    n_tiles = pl.num_programs(2)
    Lt = TH * Wp
    cout = o_ref.shape[1]

    @pl.when(jnp.logical_and(p == 0, t == 0))
    def _init():
        s1_ref[...] = jnp.zeros_like(s1_ref)
        s2_ref[...] = jnp.zeros_like(s2_ref)

    # --- convolution: ONE MXU contraction with K = KH*KW*Cin (tap-folded) -------
    taps = []
    for kh in range(KH):
        for kw in range(KW):
            off = kh * Wp + kw                         # static per-tap lane offset
            taps.append(x_ref[0, :, off:off + Lt])     # (Cin, Lt) bf16, contiguous slice
    xcat = jnp.concatenate(taps, axis=0)               # (KH*KW*Cin, Lt) bf16 sublane stack
    acc = jnp.dot(w_ref[...], xcat,
                  preferred_element_type=jnp.float32)  # (Cout, Lt) f32

    # Dropout is the identity here (dropout_op=None) -> nothing to do.

    maskf = m_ref[...]                                 # (1, Lt) valid-column mask

    # --- pass 0: accumulate InstanceNorm statistics over the row tiles ----------
    @pl.when(p == 0)
    def _stats():
        ym = acc * maskf
        s1_ref[...] += jnp.sum(ym, axis=1, keepdims=True)
        s2_ref[...] += jnp.sum(ym * acc, axis=1, keepdims=True)

    @pl.when(jnp.logical_and(p == 0, t == n_tiles - 1))
    def _finalize_stats():
        # TODO(synk): single-pass E[x^2]-mean^2 variance (f32); switch to a centered
        # / Welford form if tolerances ever tighten.
        mean = s1_ref[...] * inv_cnt
        var = jnp.maximum(s2_ref[...] * inv_cnt - mean * mean, 0.0)
        sc = g_ref[...] * jax.lax.rsqrt(var + eps)
        sc_ref[...] = sc
        sh_ref[...] = b_ref[...] - mean * sc

    # --- pass 1: normalize + LeakyReLU, emit bf16 in the chained padded layout --
    @pl.when(p == 1)
    def _apply():
        z = acc * sc_ref[...] + sh_ref[...]
        z = jnp.where(z >= 0, z, slope * z)
        z = z * maskf                                  # zero the Wp padding columns
        if pw > 0:
            # shift valid columns from [0, W) to [pw, pw + W): the output is then
            # directly in the next block's padded-column layout (left pad included);
            # the dropped trailing pw lanes are masked padding, the inserted zeros
            # become the new left pad.
            z = jnp.concatenate(
                [jnp.zeros((cout, pw), z.dtype), z[:, :Lt - pw]], axis=1)
        o_ref[0] = z.astype(o_ref.dtype)


# ---------------------------------------------------------------------------
# layout selection
# ---------------------------------------------------------------------------
def _choose_layout(H, W, KH, KW, tile_rows=None):
    """Pick (TH rows/tile, T tiles, padded row width Wp, halo'd tile rows R)."""
    if tile_rows is None:
        tile_rows = next(th for th in range(min(H, 32), 0, -1) if H % th == 0)
    assert H % tile_rows == 0, "H must be divisible by tile_rows"
    TH = tile_rows
    # padded row width: >= W + KW - 1 and TH*Wp lane-dense (multiple of 128)
    Wp = W + KW - 1
    while (TH * Wp) % 128 != 0:
        Wp += 1
    # halo'd input tile rows: >= TH + KH (halo + flat-slice guard row), R*Wp % 128 == 0
    R = TH + KH
    while (R * Wp) % 128 != 0:
        R += 1
    return TH, H // TH, Wp, R


# ---------------------------------------------------------------------------
# one ConvDropoutNormReLU block
# ---------------------------------------------------------------------------
def conv_dropout_norm_relu(a, weight, gamma, beta, *, W, TH, T, Wp, R,
                           eps=1e-5, slope=0.01, out_dtype=jnp.bfloat16):
    """One block on an activation in padded-column layout.

    a      : (N, C, H, Wp) bf16, valid pixels at columns [pw, pw + W), zeros elsewhere.
    returns: (N, Cout, H, Wp) `out_dtype`, same padded-column layout (chainable).
    """
    N, Cin, H, Wp_a = a.shape
    assert Wp_a == Wp
    Cout, Cin_w, KH, KW = weight.shape
    assert Cin == Cin_w
    ph, pw = (KH - 1) // 2, (KW - 1) // 2
    Lt = TH * Wp
    K = KH * KW * Cin

    # --- XLA glue: halo'd row tiles (the only activation copy between blocks) ---
    # tile t holds activation rows [t*TH - ph, t*TH - ph + R); OOB rows become zero.
    row_idx = jnp.arange(T)[:, None] * TH - ph + jnp.arange(R)[None, :]
    row_idx = jnp.where(row_idx < 0, H, row_idx)       # map below-range to above-range OOB
    xt = jnp.take(a, row_idx, axis=2, mode="fill", fill_value=0)  # (N, Cin, T, R, Wp)
    xt = xt.reshape(N, Cin, T * R * Wp)

    # folded conv taps: column index = (kh*KW + kw)*Cin + cin
    wcat = jnp.transpose(weight, (0, 2, 3, 1)).reshape(Cout, K).astype(jnp.bfloat16)
    g2 = gamma.reshape(Cout, 1).astype(jnp.float32)
    b2 = beta.reshape(Cout, 1).astype(jnp.float32)
    # valid-output-column mask.  Kept as a tiny resident input (constant index map,
    # no per-step DMA) rather than an in-kernel iota % Wp, for Mosaic robustness.
    maskf = ((jnp.arange(Lt) % Wp) < W).astype(jnp.float32).reshape(1, Lt)

    kernel = functools.partial(
        _block_kernel, KH=KH, KW=KW, Wp=Wp, TH=TH, pw=pw,
        eps=float(eps), slope=float(slope), inv_cnt=1.0 / float(H * W))

    # per-step VMEM working set: double-buffered blocks + big kernel temporaries
    out_isize = jnp.dtype(out_dtype).itemsize
    in_blk = Cin * R * Wp * 2
    out_blk = Cout * Lt * out_isize
    step_bytes = (2 * (in_blk + out_blk + Cout * K * 2)
                  + K * Lt * 2 + 2 * Cout * Lt * 4 + Lt * 4)
    vmem_limit = int(min(48 * 2 ** 20, max(24 * 2 ** 20, 3 * step_bytes)))

    flops = int(2 * (2 * N * T) * K * Cout * Lt + 12 * N * T * Cout * Lt)
    bytes_accessed = int(2 * N * T * in_blk + Cout * K * 2
                         + N * T * out_blk + Lt * 4 + 2 * Cout * 4)

    out = pl.pallas_call(
        kernel,
        out_shape=jax.ShapeDtypeStruct((N, Cout, H * Wp), out_dtype),
        grid_spec=pltpu.PrefetchScalarGridSpec(
            num_scalar_prefetch=0,
            grid=(N, 2, T),                            # (sample, pass, row tile)
            in_specs=[
                pl.BlockSpec((1, Cin, R * Wp), lambda n, p, t: (n, 0, t)),
                pl.BlockSpec((Cout, K), lambda n, p, t: (0, 0)),
                pl.BlockSpec((Cout, 1), lambda n, p, t: (0, 0)),
                pl.BlockSpec((Cout, 1), lambda n, p, t: (0, 0)),
                pl.BlockSpec((1, Lt), lambda n, p, t: (0, 0)),
            ],
            # Written only during pass 1; held at block (n, 0, 0) during pass 0 so
            # no unwritten block is ever flushed to HBM.
            out_specs=pl.BlockSpec((1, Cout, Lt), lambda n, p, t: (n, 0, p * t)),
            scratch_shapes=[
                pltpu.VMEM((Cout, 1), jnp.float32),    # sum
                pltpu.VMEM((Cout, 1), jnp.float32),    # sum of squares
                pltpu.VMEM((Cout, 1), jnp.float32),    # scale
                pltpu.VMEM((Cout, 1), jnp.float32),    # shift
            ],
        ),
        compiler_params=pltpu.CompilerParams(
            dimension_semantics=("parallel", "arbitrary", "arbitrary"),
            vmem_limit_bytes=vmem_limit),
        cost_estimate=pl.CostEstimate(flops=flops,
                                      transcendentals=int(N * Cout),
                                      bytes_accessed=bytes_accessed),
    )(xt, wcat, g2, b2, maskf)

    return out.reshape(N, Cout, H, Wp)


# ---------------------------------------------------------------------------
# StackedConvBlocks2.forward
# ---------------------------------------------------------------------------
def stacked_conv_blocks2(x_nchw, block_params, *, eps=1e-5, slope=0.01, tile_rows=None):
    """StackedConvBlocks2.forward: apply the ConvDropoutNormReLU blocks sequentially.

    block_params: list of (conv_weight (Cout,Cin,KH,KW), gamma (Cout,), beta (Cout,)).
    """
    N, Cin, H, W = x_nchw.shape
    KH, KW = block_params[0][0].shape[2], block_params[0][0].shape[3]
    for (w, _, _) in block_params:
        assert w.shape[2] == KH and w.shape[3] == KW
    pw = (KW - 1) // 2
    TH, T, Wp, R = _choose_layout(H, W, KH, KW, tile_rows)

    # lift the input once into the shared padded-column bf16 layout
    a = jnp.pad(x_nchw.astype(jnp.bfloat16),
                ((0, 0), (0, 0), (0, 0), (pw, Wp - W - pw)))
    for (w, g, b) in block_params:
        a = conv_dropout_norm_relu(a, w, g, b, W=W, TH=TH, T=T, Wp=Wp, R=R,
                                   eps=eps, slope=slope)
    # back to dense NCHW (only copy of the final result)
    return a[:, :, :, pw:pw + W].astype(jnp.float32)


# ---------------------------------------------------------------------------
# pure-JAX reference
# ---------------------------------------------------------------------------
def _reference(x_nchw, block_params, *, eps=1e-5, slope=0.01, matmul_dtype=None):
    """Pure-JAX reference. matmul_dtype=bf16 matches the kernel's MXU operand precision."""
    y = x_nchw
    for (w, g, b) in block_params:
        lhs, rhs = y, w
        if matmul_dtype is not None:
            lhs, rhs = lhs.astype(matmul_dtype), rhs.astype(matmul_dtype)
        c = jax.lax.conv_general_dilated(
            lhs, rhs, window_strides=(1, 1), padding="SAME",
            dimension_numbers=("NCHW", "OIHW", "NCHW"),
            preferred_element_type=jnp.float32)
        mean = jnp.mean(c, axis=(2, 3), keepdims=True)
        var = jnp.mean(jnp.square(c - mean), axis=(2, 3), keepdims=True)
        z = (c - mean) * jax.lax.rsqrt(var + eps) * g.reshape(1, -1, 1, 1) \
            + b.reshape(1, -1, 1, 1)
        y = jnp.where(z >= 0, z, slope * z)
    return y


if __name__ == "__main__":
    # StackedConvBlocks2(num_convs=2, conv_op=nn.Conv2d, input_channels=4,
    #   output_channels=8, kernel_size=3, initial_stride=1, conv_bias=False,
    #   norm_op=InstanceNorm2d(affine=True), dropout_op=None,
    #   nonlin=LeakyReLU(negative_slope=0.01), nonlin_first=False)
    key = jax.random.PRNGKey(0)
    ks = jax.random.split(key, 7)

    N, Cin, Cout, H, W = 2, 4, 8, 16, 16
    x = jax.random.normal(ks[0], (N, Cin, H, W), dtype=jnp.float32)
    w1 = 0.1 * jax.random.normal(ks[1], (Cout, Cin, 3, 3), dtype=jnp.float32)
    g1 = 1.0 + 0.1 * jax.random.normal(ks[2], (Cout,), dtype=jnp.float32)
    b1 = 0.05 * jax.random.normal(ks[3], (Cout,), dtype=jnp.float32)
    w2 = 0.1 * jax.random.normal(ks[4], (Cout, Cout, 3, 3), dtype=jnp.float32)
    g2 = 1.0 + 0.1 * jax.random.normal(ks[5], (Cout,), dtype=jnp.float32)
    b2 = 0.05 * jax.random.normal(ks[6], (Cout,), dtype=jnp.float32)
    params = [(w1, g1, b1), (w2, g2, b2)]

    # tile_rows=8 -> 2 row tiles per sample: exercises the halo'd spatial tiling and
    # the two-stage InstanceNorm path even at this small demo size.
    fwd = jax.jit(functools.partial(stacked_conv_blocks2, tile_rows=8))
    out = jax.block_until_ready(fwd(x, params))
    assert out.shape == (N, Cout, H, W), out.shape

    # Reference with MXU-matched (bf16) conv operands; norm/activation math in f32.
    ref = jax.block_until_ready(_reference(x, params, matmul_dtype=jnp.bfloat16))
    max_err = float(jnp.max(jnp.abs(out - ref)))
    # Activations are stored in bfloat16 between / after the blocks (per the perf
    # review), so the final outputs carry ~2^-8 relative rounding -> looser tolerance.
    assert jnp.allclose(out, ref, rtol=2e-2, atol=3e-2), max_err

    print("KERNEL_OK")
</pallas_src>

<mosaic_0001>
module attributes {stable_mosaic.version = 11 : i64} {
  func.func @_block_kernel(%arg0: i32, %arg1: i32, %arg2: i32, %arg3: memref<1x4x384xbf16, #tpu.memory_space<vmem>>, %arg4: memref<8x36xbf16, #tpu.memory_space<vmem>>, %arg5: memref<8x1xf32, #tpu.memory_space<vmem>>, %arg6: memref<8x1xf32, #tpu.memory_space<vmem>>, %arg7: memref<1x256xf32, #tpu.memory_space<vmem>>, %arg8: memref<1x8x256xbf16, #tpu.memory_space<vmem>>, %arg9: memref<8x1xf32, #tpu.memory_space<vmem>>, %arg10: memref<8x1xf32, #tpu.memory_space<vmem>>, %arg11: memref<8x1xf32, #tpu.memory_space<vmem>>, %arg12: memref<8x1xf32, #tpu.memory_space<vmem>>) attributes {dimension_semantics = [#tpu.dimension_semantics<parallel>, #tpu.dimension_semantics<arbitrary>, #tpu.dimension_semantics<arbitrary>], iteration_bounds = array<i64: 2, 2, 2>, scalar_prefetch = 0 : i64, scratch_operands = 4 : i64, tpu.core_type = #tpu.core_type<tc>, window_params = [{transform_indices = @transform_0, window_bounds = array<i64: 1, 4, 384>}, {pipeline_mode = #tpu.pipeline_mode<synchronous>, transform_indices = @transform_1, window_bounds = array<i64: 8, 36>}, {pipeline_mode = #tpu.pipeline_mode<synchronous>, transform_indices = @transform_2, window_bounds = array<i64: 8, 1>}, {pipeline_mode = #tpu.pipeline_mode<synchronous>, transform_indices = @transform_3, window_bounds = array<i64: 8, 1>}, {pipeline_mode = #tpu.pipeline_mode<synchronous>, transform_indices = @transform_4, window_bounds = array<i64: 1, 256>}, {transform_indices = @transform_5, window_bounds = array<i64: 1, 8, 256>}]} {
    %c0_i32 = arith.constant 0 : i32
    %0 = arith.cmpi eq, %arg1, %c0_i32 : i32
    %c0_i32_0 = arith.constant 0 : i32
    %1 = arith.cmpi eq, %arg2, %c0_i32_0 : i32
    %2 = arith.andi %0, %1 : i1
    %3 = arith.extui %2 : i1 to i32
    %c0_i32_1 = arith.constant 0 : i32
    %4 = arith.cmpi ne, %3, %c0_i32_1 : i32
    scf.if %4 {
      %cst_30 = arith.constant 0.000000e+00 : f32
      %38 = vector.broadcast %cst_30 : f32 to vector<8x1xf32>
      %c0_31 = arith.constant 0 : index
      %c0_32 = arith.constant 0 : index
      %39 = vector.load %arg9[%c0_31, %c0_32] : memref<8x1xf32, #tpu.memory_space<vmem>>, vector<8x1xf32>
      tpu.vector_store %arg9[%c0_31, %c0_32], %38 {strides = array<i32>} : memref<8x1xf32, #tpu.memory_space<vmem>>, vector<8x1xf32>,
      %cst_33 = arith.constant 0.000000e+00 : f32
      %40 = vector.broadcast %cst_33 : f32 to vector<8x1xf32>
      %c0_34 = arith.constant 0 : index
      %c0_35 = arith.constant 0 : index
      %41 = vector.load %arg10[%c0_34, %c0_35] : memref<8x1xf32, #tpu.memory_space<vmem>>, vector<8x1xf32>
      tpu.vector_store %arg10[%c0_34, %c0_35], %40 {strides = array<i32>} : memref<8x1xf32, #tpu.memory_space<vmem>>, vector<8x1xf32>,
    } else {
    }
    %c0 = arith.constant 0 : index
    %c0_2 = arith.constant 0 : index
    %c0_3 = arith.constant 0 : index
    %5 = vector.load %arg3[%c0, %c0_2, %c0_3] : memref<1x4x384xbf16, #tpu.memory_space<vmem>>, vector<1x4x256xbf16>
    %6 = vector.shape_cast %5 : vector<1x4x256xbf16> to vector<4x256xbf16>
    %c0_4 = arith.constant 0 : index
    %c0_5 = arith.constant 0 : index
    %c1 = arith.constant 1 : index
    %7 = vector.load %arg3[%c0_4, %c0_5, %c1] : memref<1x4x384xbf16, #tpu.memory_space<vmem>>, vector<1x4x256xbf16>
    %8 = vector.shape_cast %7 : vector<1x4x256xbf16> to vector<4x256xbf16>
    %c0_6 = arith.constant 0 : index
    %c0_7 = arith.constant 0 : index
    %c2 = arith.constant 2 : index
    %9 = vector.load %arg3[%c0_6, %c0_7, %c2] : memref<1x4x384xbf16, #tpu.memory_space<vmem>>, vector<1x4x256xbf16>
    %10 = vector.shape_cast %9 : vector<1x4x256xbf16> to vector<4x256xbf16>
    %c0_8 = arith.constant 0 : index
    %c0_9 = arith.constant 0 : index
    %c32 = arith.constant 32 : index
    %11 = vector.load %arg3[%c0_8, %c0_9, %c32] : memref<1x4x384xbf16, #tpu.memory_space<vmem>>, vector<1x4x256xbf16>
    %12 = vector.shape_cast %11 : vector<1x4x256xbf16> to vector<4x256xbf16>
    %c0_10 = arith.constant 0 : index
    %c0_11 = arith.constant 0 : index
    %c33 = arith.constant 33 : index
    %13 = vector.load %arg3[%c0_10, %c0_11, %c33] : memref<1x4x384xbf16, #tpu.memory_space<vmem>>, vector<1x4x256xbf16>
    %14 = vector.shape_cast %13 : vector<1x4x256xbf16> to vector<4x256xbf16>
    %c0_12 = arith.constant 0 : index
    %c0_13 = arith.constant 0 : index
    %c34 = arith.constant 34 : index
    %15 = vector.load %arg3[%c0_12, %c0_13, %c34] : memref<1x4x384xbf16, #tpu.memory_space<vmem>>, vector<1x4x256xbf16>
    %16 = vector.shape_cast %15 : vector<1x4x256xbf16> to vector<4x256xbf16>
    %c0_14 = arith.constant 0 : index
    %c0_15 = arith.constant 0 : index
    %c64 = arith.constant 64 : index
    %17 = vector.load %arg3[%c0_14, %c0_15, %c64] : memref<1x4x384xbf16, #tpu.memory_space<vmem>>, vector<1x4x256xbf16>
    %18 = vector.shape_cast %17 : vector<1x4x256xbf16> to vector<4x256xbf16>
    %c0_16 = arith.constant 0 : index
    %c0_17 = arith.constant 0 : index
    %c65 = arith.constant 65 : index
    %19 = vector.load %arg3[%c0_16, %c0_17, %c65] : memref<1x4x384xbf16, #tpu.memory_space<vmem>>, vector<1x4x256xbf16>
    %20 = vector.shape_cast %19 : vector<1x4x256xbf16> to vector<4x256xbf16>
    %c0_18 = arith.constant 0 : index
    %c0_19 = arith.constant 0 : index
    %c66 = arith.constant 66 : index
    %21 = vector.load %arg3[%c0_18, %c0_19, %c66] : memref<1x4x384xbf16, #tpu.memory_space<vmem>>, vector<1x4x256xbf16>
    %22 = vector.shape_cast %21 : vector<1x4x256xbf16> to vector<4x256xbf16>
    %23 = tpu.concatenate %6, %8, %10, %12, %14, %16, %18, %20, %22 in 0 : vector<4x256xbf16>, vector<4x256xbf16>, vector<4x256xbf16>, vector<4x256xbf16>, vector<4x256xbf16>, vector<4x256xbf16>, vector<4x256xbf16>, vector<4x256xbf16>, vector<4x256xbf16> -> vector<36x256xbf16>
    %c0_20 = arith.constant 0 : index
    %c0_21 = arith.constant 0 : index
    %24 = vector.load %arg4[%c0_20, %c0_21] : memref<8x36xbf16, #tpu.memory_space<vmem>>, vector<8x36xbf16>
    %cst = arith.constant dense<0.000000e+00> : vector<8x256xf32>
    %25 = tpu.matmul %24, %23, %cst {dimension_numbers = #tpu.dot_dimension_numbers<[1], [0], [0], [1], [0, 0, 1, 1], [], []>} : vector<8x36xbf16>, vector<36x256xbf16>, vector<8x256xf32> -> vector<8x256xf32>
    %c0_22 = arith.constant 0 : index
    %c0_23 = arith.constant 0 : index
    %26 = vector.load %arg7[%c0_22, %c0_23] : memref<1x256xf32, #tpu.memory_space<vmem>>, vector<1x256xf32>
    %c0_i32_24 = arith.constant 0 : i32
    %27 = arith.cmpi eq, %arg1, %c0_i32_24 : i32
    %28 = arith.extui %27 : i1 to i32
    %c0_i32_25 = arith.constant 0 : i32
    %29 = arith.cmpi ne, %28, %c0_i32_25 : i32
    scf.if %29 {
      %38 = vector.broadcast %26 : vector<1x256xf32> to vector<8x256xf32>
      %39 = arith.mulf %25, %38 : vector<8x256xf32>
      %c0_30 = arith.constant 0 : index
      %c0_31 = arith.constant 0 : index
      %40 = vector.load %arg9[%c0_30, %c0_31] : memref<8x1xf32, #tpu.memory_space<vmem>>, vector<8x1xf32>
      %cst_32 = arith.constant dense<0.000000e+00> : vector<8xf32>
      %41 = vector.multi_reduction <add>, %39, %cst_32 [1] : vector<8x256xf32> to vector<8xf32>
      %42 = vector.shape_cast %41 : vector<8xf32> to vector<8x1xf32>
      %43 = arith.addf %40, %42 : vector<8x1xf32>
      %c0_33 = arith.constant 0 : index
      %c0_34 = arith.constant 0 : index
      %44 = vector.load %arg9[%c0_33, %c0_34] : memref<8x1xf32, #tpu.memory_space<vmem>>, vector<8x1xf32>
      tpu.vector_store %arg9[%c0_33, %c0_34], %43 {strides = array<i32>} : memref<8x1xf32, #tpu.memory_space<vmem>>, vector<8x1xf32>,
      %c0_35 = arith.constant 0 : index
      %c0_36 = arith.constant 0 : index
      %45 = vector.load %arg10[%c0_35, %c0_36] : memref<8x1xf32, #tpu.memory_space<vmem>>, vector<8x1xf32>
      %46 = arith.mulf %39, %25 : vector<8x256xf32>
      %cst_37 = arith.constant dense<0.000000e+00> : vector<8xf32>
      %47 = vector.multi_reduction <add>, %46, %cst_37 [1] : vector<8x256xf32> to vector<8xf32>
      %48 = vector.shape_cast %47 : vector<8xf32> to vector<8x1xf32>
      %49 = arith.addf %45, %48 : vector<8x1xf32>
      %c0_38 = arith.constant 0 : index
      %c0_39 = arith.constant 0 : index
      %50 = vector.load %arg10[%c0_38, %c0_39] : memref<8x1xf32, #tpu.memory_space<vmem>>, vector<8x1xf32>
      tpu.vector_store %arg10[%c0_38, %c0_39], %49 {strides = array<i32>} : memref<8x1xf32, #tpu.memory_space<vmem>>, vector<8x1xf32>,
    } else {
    }
    %c0_i32_26 = arith.constant 0 : i32
    %30 = arith.cmpi eq, %arg1, %c0_i32_26 : i32
    %c1_i32 = arith.constant 1 : i32
    %31 = arith.cmpi eq, %arg2, %c1_i32 : i32
    %32 = arith.andi %30, %31 : i1
    %33 = arith.extui %32 : i1 to i32
    %c0_i32_27 = arith.constant 0 : i32
    %34 = arith.cmpi ne, %33, %c0_i32_27 : i32
    scf.if %34 {
      %c0_30 = arith.constant 0 : index
      %c0_31 = arith.constant 0 : index
      %38 = vector.load %arg9[%c0_30, %c0_31] : memref<8x1xf32, #tpu.memory_space<vmem>>, vector<8x1xf32>
      %cst_32 = arith.constant 3.906250e-03 : f32
      %39 = vector.broadcast %cst_32 : f32 to vector<8x1xf32>
      %40 = arith.mulf %38, %39 : vector<8x1xf32>
      %c0_33 = arith.constant 0 : index
      %c0_34 = arith.constant 0 : index
      %41 = vector.load %arg10[%c0_33, %c0_34] : memref<8x1xf32, #tpu.memory_space<vmem>>, vector<8x1xf32>
      %cst_35 = arith.constant 3.906250e-03 : f32
      %42 = vector.broadcast %cst_35 : f32 to vector<8x1xf32>
      %43 = arith.mulf %41, %42 : vector<8x1xf32>
      %44 = arith.mulf %40, %40 : vector<8x1xf32>
      %45 = arith.subf %43, %44 : vector<8x1xf32>
      %cst_36 = arith.constant 0.000000e+00 : f32
      %46 = vector.broadcast %cst_36 : f32 to vector<8x1xf32>
      %47 = arith.maximumf %45, %46 : vector<8x1xf32>
      %c0_37 = arith.constant 0 : index
      %c0_38 = arith.constant 0 : index
      %48 = vector.load %arg5[%c0_37, %c0_38] : memref<8x1xf32, #tpu.memory_space<vmem>>, vector<8x1xf32>
      %cst_39 = arith.constant 9.99999974E-6 : f32
      %49 = vector.broadcast %cst_39 : f32 to vector<8x1xf32>
      %50 = arith.addf %47, %49 : vector<8x1xf32>
      %51 = math.rsqrt %50 : vector<8x1xf32>
      %52 = arith.mulf %48, %51 : vector<8x1xf32>
      %c0_40 = arith.constant 0 : index
      %c0_41 = arith.constant 0 : index
      %53 = vector.load %arg11[%c0_40, %c0_41] : memref<8x1xf32, #tpu.memory_space<vmem>>, vector<8x1xf32>
      tpu.vector_store %arg11[%c0_40, %c0_41], %52 {strides = array<i32>} : memref<8x1xf32, #tpu.memory_space<vmem>>, vector<8x1xf32>,
      %c0_42 = arith.constant 0 : index
      %c0_43 = arith.constant 0 : index
      %54 = vector.load %arg6[%c0_42, %c0_43] : memref<8x1xf32, #tpu.memory_space<vmem>>, vector<8x1xf32>
      %55 = arith.mulf %40, %52 : vector<8x1xf32>
      %56 = arith.subf %54, %55 : vector<8x1xf32>
      %c0_44 = arith.constant 0 : index
      %c0_45 = arith.constant 0 : index
      %57 = vector.load %arg12[%c0_44, %c0_45] : memref<8x1xf32, #tpu.memory_space<vmem>>, vector<8x1xf32>
      tpu.vector_store %arg12[%c0_44, %c0_45], %56 {strides = array<i32>} : memref<8x1xf32, #tpu.memory_space<vmem>>, vector<8x1xf32>,
    } else {
    }
    %c1_i32_28 = arith.constant 1 : i32
    %35 = arith.cmpi eq, %arg1, %c1_i32_28 : i32
    %36 = arith.extui %35 : i1 to i32
    %c0_i32_29 = arith.constant 0 : i32
    %37 = arith.cmpi ne, %36, %c0_i32_29 : i32
    scf.if %37 {
      %c0_30 = arith.constant 0 : index
      %c0_31 = arith.constant 0 : index
      %38 = vector.load %arg11[%c0_30, %c0_31] : memref<8x1xf32, #tpu.memory_space<vmem>>, vector<8x1xf32>
      %39 = vector.broadcast %38 : vector<8x1xf32> to vector<8x256xf32>
      %40 = arith.mulf %25, %39 : vector<8x256xf32>
      %c0_32 = arith.constant 0 : index
      %c0_33 = arith.constant 0 : index
      %41 = vector.load %arg12[%c0_32, %c0_33] : memref<8x1xf32, #tpu.memory_space<vmem>>, vector<8x1xf32>
      %42 = vector.broadcast %41 : vector<8x1xf32> to vector<8x256xf32>
      %43 = arith.addf %40, %42 : vector<8x256xf32>
      %cst_34 = arith.constant 0.000000e+00 : f32
      %44 = vector.broadcast %cst_34 : f32 to vector<8x256xf32>
      %45 = arith.cmpf oge, %43, %44 : vector<8x256xf32>
      %cst_35 = arith.constant 0.00999999977 : f32
      %46 = vector.broadcast %cst_35 : f32 to vector<8x256xf32>
      %47 = arith.mulf %46, %43 : vector<8x256xf32>
      %48 = arith.select %45, %43, %47 : vector<8x256xi1>, vector<8x256xf32>
      %49 = vector.broadcast %26 : vector<1x256xf32> to vector<8x256xf32>
      %50 = arith.mulf %48, %49 : vector<8x256xf32>
      %cst_36 = arith.constant 0.000000e+00 : f32
      %51 = vector.broadcast %cst_36 : f32 to vector<8x1xf32>
      %52 = vector.extract_strided_slice %50 {offsets = [0, 0], sizes = [8, 255], strides = [1, 1]} : vector<8x256xf32> to vector<8x255xf32>
      %53 = tpu.concatenate %51, %52 in 1 : vector<8x1xf32>, vector<8x255xf32> -> vector<8x256xf32>
      %54 = arith.truncf %53 : vector<8x256xf32> to vector<8x256xbf16>
      %c0_37 = arith.constant 0 : index
      %c0_38 = arith.constant 0 : index
      %c0_39 = arith.constant 0 : index
      %55 = vector.load %arg8[%c0_37, %c0_38, %c0_39] : memref<1x8x256xbf16, #tpu.memory_space<vmem>>, vector<1x8x256xbf16>
      %56 = vector.shape_cast %55 : vector<1x8x256xbf16> to vector<8x256xbf16>
      %57 = vector.shape_cast %54 : vector<8x256xbf16> to vector<1x8x256xbf16>
      tpu.vector_store %arg8[%c0_37, %c0_38, %c0_39], %57 {strides = array<i32>} : memref<1x8x256xbf16, #tpu.memory_space<vmem>>, vector<1x8x256xbf16>,
    } else {
    }
    return
  }
  func.func @transform_0(%arg0: i32, %arg1: i32, %arg2: i32) -> (i32, i32, i32) {
    %c0_i32 = arith.constant 0 : i32
    %c0_i32_0 = arith.constant 0 : i32
    return %arg0, %c0_i32, %arg2 : i32, i32, i32
  }
  func.func @transform_1(%arg0: i32, %arg1: i32, %arg2: i32) -> (i32, i32) {
    %c0_i32 = arith.constant 0 : i32
    %c0_i32_0 = arith.constant 0 : i32
    %c0_i32_1 = arith.constant 0 : i32
    return %c0_i32, %c0_i32_0 : i32, i32
  }
  func.func @transform_2(%arg0: i32, %arg1: i32, %arg2: i32) -> (i32, i32) {
    %c0_i32 = arith.constant 0 : i32
    %c0_i32_0 = arith.constant 0 : i32
    %c0_i32_1 = arith.constant 0 : i32
    return %c0_i32, %c0_i32_0 : i32, i32
  }
  func.func @transform_3(%arg0: i32, %arg1: i32, %arg2: i32) -> (i32, i32) {
    %c0_i32 = arith.constant 0 : i32
    %c0_i32_0 = arith.constant 0 : i32
    %c0_i32_1 = arith.constant 0 : i32
    return %c0_i32, %c0_i32_0 : i32, i32
  }
  func.func @transform_4(%arg0: i32, %arg1: i32, %arg2: i32) -> (i32, i32) {
    %c0_i32 = arith.constant 0 : i32
    %c0_i32_0 = arith.constant 0 : i32
    %c0_i32_1 = arith.constant 0 : i32
    return %c0_i32, %c0_i32_0 : i32, i32
  }
  func.func @transform_5(%arg0: i32, %arg1: i32, %arg2: i32) -> (i32, i32, i32) {
    %0 = arith.muli %arg1, %arg2 : i32
    %c0_i32 = arith.constant 0 : i32
    %c0_i32_0 = arith.constant 0 : i32
    return %arg0, %c0_i32, %0 : i32, i32, i32
  }
}

module attributes {stable_mosaic.version = 11 : i64} {
  func.func @_block_kernel(%arg0: i32, %arg1: i32, %arg2: i32, %arg3: memref<1x8x384xbf16, #tpu.memory_space<vmem>>, %arg4: memref<8x72xbf16, #tpu.memory_space<vmem>>, %arg5: memref<8x1xf32, #tpu.memory_space<vmem>>, %arg6: memref<8x1xf32, #tpu.memory_space<vmem>>, %arg7: memref<1x256xf32, #tpu.memory_space<vmem>>, %arg8: memref<1x8x256xbf16, #tpu.memory_space<vmem>>, %arg9: memref<8x1xf32, #tpu.memory_space<vmem>>, %arg10: memref<8x1xf32, #tpu.memory_space<vmem>>, %arg11: memref<8x1xf32, #tpu.memory_space<vmem>>, %arg12: memref<8x1xf32, #tpu.memory_space<vmem>>) attributes {dimension_semantics = [#tpu.dimension_semantics<parallel>, #tpu.dimension_semantics<arbitrary>, #tpu.dimension_semantics<arbitrary>], iteration_bounds = array<i64: 2, 2, 2>, scalar_prefetch = 0 : i64, scratch_operands = 4 : i64, tpu.core_type = #tpu.core_type<tc>, window_params = [{transform_indices = @transform_0, window_bounds = array<i64: 1, 8, 384>}, {pipeline_mode = #tpu.pipeline_mode<synchronous>, transform_indices = @transform_1, window_bounds = array<i64: 8, 72>}, {pipeline_mode = #tpu.pipeline_mode<synchronous>, transform_indices = @transform_2, window_bounds = array<i64: 8, 1>}, {pipeline_mode = #tpu.pipeline_mode<synchronous>, transform_indices = @transform_3, window_bounds = array<i64: 8, 1>}, {pipeline_mode = #tpu.pipeline_mode<synchronous>, transform_indices = @transform_4, window_bounds = array<i64: 1, 256>}, {transform_indices = @transform_5, window_bounds = array<i64: 1, 8, 256>}]} {
    %c0_i32 = arith.constant 0 : i32
    %0 = arith.cmpi eq, %arg1, %c0_i32 : i32
    %c0_i32_0 = arith.constant 0 : i32
    %1 = arith.cmpi eq, %arg2, %c0_i32_0 : i32
    %2 = arith.andi %0, %1 : i1
    %3 = arith.extui %2 : i1 to i32
    %c0_i32_1 = arith.constant 0 : i32
    %4 = arith.cmpi ne, %3, %c0_i32_1 : i32
    scf.if %4 {
      %cst_30 = arith.constant 0.000000e+00 : f32
      %38 = vector.broadcast %cst_30 : f32 to vector<8x1xf32>
      %c0_31 = arith.constant 0 : index
      %c0_32 = arith.constant 0 : index
      %39 = vector.load %arg9[%c0_31, %c0_32] : memref<8x1xf32, #tpu.memory_space<vmem>>, vector<8x1xf32>
      tpu.vector_store %arg9[%c0_31, %c0_32], %38 {strides = array<i32>} : memref<8x1xf32, #tpu.memory_space<vmem>>, vector<8x1xf32>,
      %cst_33 = arith.constant 0.000000e+00 : f32
      %40 = vector.broadcast %cst_33 : f32 to vector<8x1xf32>
      %c0_34 = arith.constant 0 : index
      %c0_35 = arith.constant 0 : index
      %41 = vector.load %arg10[%c0_34, %c0_35] : memref<8x1xf32, #tpu.memory_space<vmem>>, vector<8x1xf32>
      tpu.vector_store %arg10[%c0_34, %c0_35], %40 {strides = array<i32>} : memref<8x1xf32, #tpu.memory_space<vmem>>, vector<8x1xf32>,
    } else {
    }
    %c0 = arith.constant 0 : index
    %c0_2 = arith.constant 0 : index
    %c0_3 = arith.constant 0 : index
    %5 = vector.load %arg3[%c0, %c0_2, %c0_3] : memref<1x8x384xbf16, #tpu.memory_space<vmem>>, vector<1x8x256xbf16>
    %6 = vector.shape_cast %5 : vector<1x8x256xbf16> to vector<8x256xbf16>
    %c0_4 = arith.constant 0 : index
    %c0_5 = arith.constant 0 : index
    %c1 = arith.constant 1 : index
    %7 = vector.load %arg3[%c0_4, %c0_5, %c1] : memref<1x8x384xbf16, #tpu.memory_space<vmem>>, vector<1x8x256xbf16>
    %8 = vector.shape_cast %7 : vector<1x8x256xbf16> to vector<8x256xbf16>
    %c0_6 = arith.constant 0 : index
    %c0_7 = arith.constant 0 : index
    %c2 = arith.constant 2 : index
    %9 = vector.load %arg3[%c0_6, %c0_7, %c2] : memref<1x8x384xbf16, #tpu.memory_space<vmem>>, vector<1x8x256xbf16>
    %10 = vector.shape_cast %9 : vector<1x8x256xbf16> to vector<8x256xbf16>
    %c0_8 = arith.constant 0 : index
    %c0_9 = arith.constant 0 : index
    %c32 = arith.constant 32 : index
    %11 = vector.load %arg3[%c0_8, %c0_9, %c32] : memref<1x8x384xbf16, #tpu.memory_space<vmem>>, vector<1x8x256xbf16>
    %12 = vector.shape_cast %11 : vector<1x8x256xbf16> to vector<8x256xbf16>
    %c0_10 = arith.constant 0 : index
    %c0_11 = arith.constant 0 : index
    %c33 = arith.constant 33 : index
    %13 = vector.load %arg3[%c0_10, %c0_11, %c33] : memref<1x8x384xbf16, #tpu.memory_space<vmem>>, vector<1x8x256xbf16>
    %14 = vector.shape_cast %13 : vector<1x8x256xbf16> to vector<8x256xbf16>
    %c0_12 = arith.constant 0 : index
    %c0_13 = arith.constant 0 : index
    %c34 = arith.constant 34 : index
    %15 = vector.load %arg3[%c0_12, %c0_13, %c34] : memref<1x8x384xbf16, #tpu.memory_space<vmem>>, vector<1x8x256xbf16>
    %16 = vector.shape_cast %15 : vector<1x8x256xbf16> to vector<8x256xbf16>
    %c0_14 = arith.constant 0 : index
    %c0_15 = arith.constant 0 : index
    %c64 = arith.constant 64 : index
    %17 = vector.load %arg3[%c0_14, %c0_15, %c64] : memref<1x8x384xbf16, #tpu.memory_space<vmem>>, vector<1x8x256xbf16>
    %18 = vector.shape_cast %17 : vector<1x8x256xbf16> to vector<8x256xbf16>
    %c0_16 = arith.constant 0 : index
    %c0_17 = arith.constant 0 : index
    %c65 = arith.constant 65 : index
    %19 = vector.load %arg3[%c0_16, %c0_17, %c65] : memref<1x8x384xbf16, #tpu.memory_space<vmem>>, vector<1x8x256xbf16>
    %20 = vector.shape_cast %19 : vector<1x8x256xbf16> to vector<8x256xbf16>
    %c0_18 = arith.constant 0 : index
    %c0_19 = arith.constant 0 : index
    %c66 = arith.constant 66 : index
    %21 = vector.load %arg3[%c0_18, %c0_19, %c66] : memref<1x8x384xbf16, #tpu.memory_space<vmem>>, vector<1x8x256xbf16>
    %22 = vector.shape_cast %21 : vector<1x8x256xbf16> to vector<8x256xbf16>
    %23 = tpu.concatenate %6, %8, %10, %12, %14, %16, %18, %20, %22 in 0 : vector<8x256xbf16>, vector<8x256xbf16>, vector<8x256xbf16>, vector<8x256xbf16>, vector<8x256xbf16>, vector<8x256xbf16>, vector<8x256xbf16>, vector<8x256xbf16>, vector<8x256xbf16> -> vector<72x256xbf16>
    %c0_20 = arith.constant 0 : index
    %c0_21 = arith.constant 0 : index
    %24 = vector.load %arg4[%c0_20, %c0_21] : memref<8x72xbf16, #tpu.memory_space<vmem>>, vector<8x72xbf16>
    %cst = arith.constant dense<0.000000e+00> : vector<8x256xf32>
    %25 = tpu.matmul %24, %23, %cst {dimension_numbers = #tpu.dot_dimension_numbers<[1], [0], [0], [1], [0, 0, 1, 1], [], []>} : vector<8x72xbf16>, vector<72x256xbf16>, vector<8x256xf32> -> vector<8x256xf32>
    %c0_22 = arith.constant 0 : index
    %c0_23 = arith.constant 0 : index
    %26 = vector.load %arg7[%c0_22, %c0_23] : memref<1x256xf32, #tpu.memory_space<vmem>>, vector<1x256xf32>
    %c0_i32_24 = arith.constant 0 : i32
    %27 = arith.cmpi eq, %arg1, %c0_i32_24 : i32
    %28 = arith.extui %27 : i1 to i32
    %c0_i32_25 = arith.constant 0 : i32
    %29 = arith.cmpi ne, %28, %c0_i32_25 : i32
    scf.if %29 {
      %38 = vector.broadcast %26 : vector<1x256xf32> to vector<8x256xf32>
      %39 = arith.mulf %25, %38 : vector<8x256xf32>
      %c0_30 = arith.constant 0 : index
      %c0_31 = arith.constant 0 : index
      %40 = vector.load %arg9[%c0_30, %c0_31] : memref<8x1xf32, #tpu.memory_space<vmem>>, vector<8x1xf32>
      %cst_32 = arith.constant dense<0.000000e+00> : vector<8xf32>
      %41 = vector.multi_reduction <add>, %39, %cst_32 [1] : vector<8x256xf32> to vector<8xf32>
      %42 = vector.shape_cast %41 : vector<8xf32> to vector<8x1xf32>
      %43 = arith.addf %40, %42 : vector<8x1xf32>
      %c0_33 = arith.constant 0 : index
      %c0_34 = arith.constant 0 : index
      %44 = vector.load %arg9[%c0_33, %c0_34] : memref<8x1xf32, #tpu.memory_space<vmem>>, vector<8x1xf32>
      tpu.vector_store %arg9[%c0_33, %c0_34], %43 {strides = array<i32>} : memref<8x1xf32, #tpu.memory_space<vmem>>, vector<8x1xf32>,
      %c0_35 = arith.constant 0 : index
      %c0_36 = arith.constant 0 : index
      %45 = vector.load %arg10[%c0_35, %c0_36] : memref<8x1xf32, #tpu.memory_space<vmem>>, vector<8x1xf32>
      %46 = arith.mulf %39, %25 : vector<8x256xf32>
      %cst_37 = arith.constant dense<0.000000e+00> : vector<8xf32>
      %47 = vector.multi_reduction <add>, %46, %cst_37 [1] : vector<8x256xf32> to vector<8xf32>
      %48 = vector.shape_cast %47 : vector<8xf32> to vector<8x1xf32>
      %49 = arith.addf %45, %48 : vector<8x1xf32>
      %c0_38 = arith.constant 0 : index
      %c0_39 = arith.constant 0 : index
      %50 = vector.load %arg10[%c0_38, %c0_39] : memref<8x1xf32, #tpu.memory_space<vmem>>, vector<8x1xf32>
      tpu.vector_store %arg10[%c0_38, %c0_39], %49 {strides = array<i32>} : memref<8x1xf32, #tpu.memory_space<vmem>>, vector<8x1xf32>,
    } else {
    }
    %c0_i32_26 = arith.constant 0 : i32
    %30 = arith.cmpi eq, %arg1, %c0_i32_26 : i32
    %c1_i32 = arith.constant 1 : i32
    %31 = arith.cmpi eq, %arg2, %c1_i32 : i32
    %32 = arith.andi %30, %31 : i1
    %33 = arith.extui %32 : i1 to i32
    %c0_i32_27 = arith.constant 0 : i32
    %34 = arith.cmpi ne, %33, %c0_i32_27 : i32
    scf.if %34 {
      %c0_30 = arith.constant 0 : index
      %c0_31 = arith.constant 0 : index
      %38 = vector.load %arg9[%c0_30, %c0_31] : memref<8x1xf32, #tpu.memory_space<vmem>>, vector<8x1xf32>
      %cst_32 = arith.constant 3.906250e-03 : f32
      %39 = vector.broadcast %cst_32 : f32 to vector<8x1xf32>
      %40 = arith.mulf %38, %39 : vector<8x1xf32>
      %c0_33 = arith.constant 0 : index
      %c0_34 = arith.constant 0 : index
      %41 = vector.load %arg10[%c0_33, %c0_34] : memref<8x1xf32, #tpu.memory_space<vmem>>, vector<8x1xf32>
      %cst_35 = arith.constant 3.906250e-03 : f32
      %42 = vector.broadcast %cst_35 : f32 to vector<8x1xf32>
      %43 = arith.mulf %41, %42 : vector<8x1xf32>
      %44 = arith.mulf %40, %40 : vector<8x1xf32>
      %45 = arith.subf %43, %44 : vector<8x1xf32>
      %cst_36 = arith.constant 0.000000e+00 : f32
      %46 = vector.broadcast %cst_36 : f32 to vector<8x1xf32>
      %47 = arith.maximumf %45, %46 : vector<8x1xf32>
      %c0_37 = arith.constant 0 : index
      %c0_38 = arith.constant 0 : index
      %48 = vector.load %arg5[%c0_37, %c0_38] : memref<8x1xf32, #tpu.memory_space<vmem>>, vector<8x1xf32>
      %cst_39 = arith.constant 9.99999974E-6 : f32
      %49 = vector.broadcast %cst_39 : f32 to vector<8x1xf32>
      %50 = arith.addf %47, %49 : vector<8x1xf32>
      %51 = math.rsqrt %50 : vector<8x1xf32>
      %52 = arith.mulf %48, %51 : vector<8x1xf32>
      %c0_40 = arith.constant 0 : index
      %c0_41 = arith.constant 0 : index
      %53 = vector.load %arg11[%c0_40, %c0_41] : memref<8x1xf32, #tpu.memory_space<vmem>>, vector<8x1xf32>
      tpu.vector_store %arg11[%c0_40, %c0_41], %52 {strides = array<i32>} : memref<8x1xf32, #tpu.memory_space<vmem>>, vector<8x1xf32>,
      %c0_42 = arith.constant 0 : index
      %c0_43 = arith.constant 0 : index
      %54 = vector.load %arg6[%c0_42, %c0_43] : memref<8x1xf32, #tpu.memory_space<vmem>>, vector<8x1xf32>
      %55 = arith.mulf %40, %52 : vector<8x1xf32>
      %56 = arith.subf %54, %55 : vector<8x1xf32>
      %c0_44 = arith.constant 0 : index
      %c0_45 = arith.constant 0 : index
      %57 = vector.load %arg12[%c0_44, %c0_45] : memref<8x1xf32, #tpu.memory_space<vmem>>, vector<8x1xf32>
      tpu.vector_store %arg12[%c0_44, %c0_45], %56 {strides = array<i32>} : memref<8x1xf32, #tpu.memory_space<vmem>>, vector<8x1xf32>,
    } else {
    }
    %c1_i32_28 = arith.constant 1 : i32
    %35 = arith.cmpi eq, %arg1, %c1_i32_28 : i32
    %36 = arith.extui %35 : i1 to i32
    %c0_i32_29 = arith.constant 0 : i32
    %37 = arith.cmpi ne, %36, %c0_i32_29 : i32
    scf.if %37 {
      %c0_30 = arith.constant 0 : index
      %c0_31 = arith.constant 0 : index
      %38 = vector.load %arg11[%c0_30, %c0_31] : memref<8x1xf32, #tpu.memory_space<vmem>>, vector<8x1xf32>
      %39 = vector.broadcast %38 : vector<8x1xf32> to vector<8x256xf32>
      %40 = arith.mulf %25, %39 : vector<8x256xf32>
      %c0_32 = arith.constant 0 : index
      %c0_33 = arith.constant 0 : index
      %41 = vector.load %arg12[%c0_32, %c0_33] : memref<8x1xf32, #tpu.memory_space<vmem>>, vector<8x1xf32>
      %42 = vector.broadcast %41 : vector<8x1xf32> to vector<8x256xf32>
      %43 = arith.addf %40, %42 : vector<8x256xf32>
      %cst_34 = arith.constant 0.000000e+00 : f32
      %44 = vector.broadcast %cst_34 : f32 to vector<8x256xf32>
      %45 = arith.cmpf oge, %43, %44 : vector<8x256xf32>
      %cst_35 = arith.constant 0.00999999977 : f32
      %46 = vector.broadcast %cst_35 : f32 to vector<8x256xf32>
      %47 = arith.mulf %46, %43 : vector<8x256xf32>
      %48 = arith.select %45, %43, %47 : vector<8x256xi1>, vector<8x256xf32>
      %49 = vector.broadcast %26 : vector<1x256xf32> to vector<8x256xf32>
      %50 = arith.mulf %48, %49 : vector<8x256xf32>
      %cst_36 = arith.constant 0.000000e+00 : f32
      %51 = vector.broadcast %cst_36 : f32 to vector<8x1xf32>
      %52 = vector.extract_strided_slice %50 {offsets = [0, 0], sizes = [8, 255], strides = [1, 1]} : vector<8x256xf32> to vector<8x255xf32>
      %53 = tpu.concatenate %51, %52 in 1 : vector<8x1xf32>, vector<8x255xf32> -> vector<8x256xf32>
      %54 = arith.truncf %53 : vector<8x256xf32> to vector<8x256xbf16>
      %c0_37 = arith.constant 0 : index
      %c0_38 = arith.constant 0 : index
      %c0_39 = arith.constant 0 : index
      %55 = vector.load %arg8[%c0_37, %c0_38, %c0_39] : memref<1x8x256xbf16, #tpu.memory_space<vmem>>, vector<1x8x256xbf16>
      %56 = vector.shape_cast %55 : vector<1x8x256xbf16> to vector<8x256xbf16>
      %57 = vector.shape_cast %54 : vector<8x256xbf16> to vector<1x8x256xbf16>
      tpu.vector_store %arg8[%c0_37, %c0_38, %c0_39], %57 {strides = array<i32>} : memref<1x8x256xbf16, #tpu.memory_space<vmem>>, vector<1x8x256xbf16>,
    } else {
    }
    return
  }
  func.func @transform_0(%arg0: i32, %arg1: i32, %arg2: i32) -> (i32, i32, i32) {
    %c0_i32 = arith.constant 0 : i32
    %c0_i32_0 = arith.constant 0 : i32
    return %arg0, %c0_i32, %arg2 : i32, i32, i32
  }
  func.func @transform_1(%arg0: i32, %arg1: i32, %arg2: i32) -> (i32, i32) {
    %c0_i32 = arith.constant 0 : i32
    %c0_i32_0 = arith.constant 0 : i32
    %c0_i32_1 = arith.constant 0 : i32
    return %c0_i32, %c0_i32_0 : i32, i32
  }
  func.func @transform_2(%arg0: i32, %arg1: i32, %arg2: i32) -> (i32, i32) {
    %c0_i32 = arith.constant 0 : i32
    %c0_i32_0 = arith.constant 0 : i32
    %c0_i32_1 = arith.constant 0 : i32
    return %c0_i32, %c0_i32_0 : i32, i32
  }
  func.func @transform_3(%arg0: i32, %arg1: i32, %arg2: i32) -> (i32, i32) {
    %c0_i32 = arith.constant 0 : i32
    %c0_i32_0 = arith.constant 0 : i32
    %c0_i32_1 = arith.constant 0 : i32
    return %c0_i32, %c0_i32_0 : i32, i32
  }
  func.func @transform_4(%arg0: i32, %arg1: i32, %arg2: i32) -> (i32, i32) {
    %c0_i32 = arith.constant 0 : i32
    %c0_i32_0 = arith.constant 0 : i32
    %c0_i32_1 = arith.constant 0 : i32
    return %c0_i32, %c0_i32_0 : i32, i32
  }
  func.func @transform_5(%arg0: i32, %arg1: i32, %arg2: i32) -> (i32, i32, i32) {
    %0 = arith.muli %arg1, %arg2 : i32
    %c0_i32 = arith.constant 0 : i32
    %c0_i32_0 = arith.constant 0 : i32
    return %arg0, %c0_i32, %0 : i32, i32, i32
  }
}

</mosaic_0001>

<bundles_post_ra>
// kernel: stacked_conv_blocks2.2
= control target key start
LH: loop header
LB: loop body
LE: loop exit
PB: predicated region body
PF: predicated region fallthrough
CT: control target
= control target key end

     0   :  { %s894_s18 = smov 0   ;;  %s896_s19 = smov 0   ;;  %s1031_s0 = inlined_call_operand.vmem [shape: bf16[2,4,768], index: 0, kind: input, shape index: {}]   ;;  %s1032_s1 = inlined_call_operand.vmem [shape: bf16[8,36], index: 1, kind: input, shape index: {}]   ;;  %s1033_s2 = inlined_call_operand.vmem [shape: f32[8,1], index: 2, kind: input, shape index: {}]   ;;  %s1034_s3 = inlined_call_operand.vmem [shape: f32[8,1], index: 3, kind: input, shape index: {}]   ;;  %s1035_s4 = inlined_call_operand.vmem [shape: f32[1,256], index: 4, kind: input, shape index: {}]   ;;  %s1036_s5 = inlined_call_operand.vmem [shape: bf16[2,8,512], index: 5, kind: output, shape index: {}]  }
   0x1   :  { %s898_s20 = smov 0   ;;  %s900_s21 = smov 0  }
   0x2   :  { %s902_s22 = smov 0   ;;  %s904_s23 = smov 0  }
   0x3   :  { %s906_s24 = smov 0  }
   0x4 LB: > { %s27_s25 = sadd.s32 1, %s837_s21  ;;  %s30_s26 = sadd.s32 1, %s841_s22  ;;  %s849_s24 = sphi %s906_s24, %s15_s24   ;;  %s845_s23 = sphi %s904_s23, %s1042_s23   ;;  %s841_s22 = sphi %s902_s22, %s1041_s22   ;;  %s837_s21 = sphi %s900_s21, %s1040_s21   ;;  %s833_s20 = sphi %s898_s20, %s1039_s20   ;;  %s829_s19 = sphi %s896_s19, %s1038_s19   ;;  %s825_s18 = sphi %s894_s18, %s1037_s18  }
   0x5   : > { %p28_p0 = scmp.ge.s32.totalorder %s27_s25, 2  ;;  %p701_p1 = scmp.ge.s32.totalorder %s849_s24, 1 }
   0x6   : > { %p217_p2 = scmp.lt.s32.totalorder %s849_s24, 9  ;;  %s34_s27 = sadd.s32 1, %s845_s23 }
   0x7   : > { %s1044_s25 = smov (%p28_p0, %s27_s25), 0  ;;  %s1046_s26 = smov (!%p28_p0, %s30_s26), %s841_s22 }
   0x8   : > { %p218_p3 = pnand %p701_p1, %p217_p2  ;;  %p32_p4 = scmp.ge.s32.totalorder %s1046_s26, 2 }
   0x9   : > { %s254_s28 = smul.u32 (!%p218_p3), 3, %s825_s18  ;;  %p255_p6 = scmp.lt.s32.totalorder (!%p218_p3), %s833_s20, 1 }
   0xa   : > { %s1048_s26 = smov (%p32_p4, %s1046_s26), 0  ;;  %s1050_s27 = smov (!%p32_p4, %s34_s27), %s845_s23 }
   0xb   : > { %p36_p5 = scmp.ge.s32.totalorder %s1050_s27, 2  ;;  %221 = sbr.rel (%p218_p3) target bundleno = 863 (0x35f), region = 40 }
   0xc   : > { %s264_s29 = smul.u32 (!%p218_p3), %s825_s18, %s829_s19  ;;  %p277_p7 = scmp.eq.s32.totalorder (!%p218_p3), %s829_s19, 0 }
   0xd   : > { %s1052_s27 = smov (%p36_p5, %s1050_s27), 0  ;;  %p257_p8 = scmp.lt.s32.totalorder (!%p218_p3), %s254_s28, 5 }
   0xe   : > { %s703_s30 = sshll.u32 (!%p218_p3), %s264_s29, 1  ;;  %p278_p10 = scmp.eq.s32.totalorder (!%p218_p3), %s825_s18, 0 }
   0xf   : > { %p268_p9 = scmp.lt.s32.totalorder (!%p218_p3), %s703_s30, 3 }
  0x10   : > { %s1054_s20 = smov (!%p255_p6, %s833_s20), 1  ;;  %s1056_s28 = smov (!%p257_p8, %s254_s28), 5 }
  0x11   : > { %s715_s6 = smul.u32 6, %s1054_s20  ;;  %s1058_s30 = smov (!%p268_p9, %s703_s30), 3 }
  0x12   : > { %s704_s8 = sshll.u32 %s1054_s20, 2  ;;  %p279_p11 = pnand %p278_p10, %p277_p7 }
  0x13   : > { %s260_s7 = sadd.s32 %s715_s6, %s1056_s28  ;;  %s271_s10 = sadd.s32 %s704_s8, %s1058_s30 }
  0x14   : > { %s702_s9 = sshll.u32 %s260_s7, 1  ;;  %s705_s14 = sshll.u32 %s271_s10, 2 }
  0x15   : > { %s947_s13 = scalar_lea.vmem %s1031_s0, %s702_s9  ;;  %s952_s17 = scalar_lea.vmem %s1036_s5, %s705_s14 }
  0x16   : > { %282 = sbr.rel (%p279_p11) target bundleno = 29 (0x1d), region = 44 }
  0x1b   : > { %vm283_vm0 = vcmask 7168   ;;  %v851_v0 = vmov 0.0  }
  0x1c   : > { %284 = vst.msk [vmem:[#allocation2] sm:$0xff] %vm283_vm0, %v851_v0  ;;  %285 = vst.msk [vmem:[#allocation3] sm:$0xff] %vm283_vm0, %v851_v0 }
  0x1d PF: > { %v287_v1 = vld [vmem:[%s947_s13] sm:$0x3f]  ;;  %v302_v2 = vlaneseq  ;;  %v852_v3 = vmov 1983009808   ;;  %s853_s20 = smov 62   ;;  %s854_s28 = smov 95  }
  0x1e   : > { %v300_v4 = vunpack.c.l.s4 %v852_v3  ;;  %v323_v7 = vcombine.high %v287_v1, %v287_v1  ;;  %v298_v9 = vcombine.low %v287_v1, %v287_v1  ;;  %s855_s29 = smov 94   ;;  %s856_s30 = smov 64   ;;  %v859_v18 = vmov 0  }
  0x1f   : > { %v958_v5 = vshrl.u32 %v302_v2, 7  ;;  %s857_s6 = smov 63   ;;  %s858_s7 = smov 127   ;;  %476 = vmatprep.mubr.bf16.mxu0 %v859_v18  ;;  %vm395_vm1 = vcmask 506880   ;;  %vm398_vm2 = vcmask 1041408   ;;  %vm368_vm3 = vcmask 769024  }
  0x20   : > { %v301_v6 = vunpack.c.0.s8 %v300_v4  ;;  %s860_s8 = smov 126   ;;  %s861_s9 = smov 96   ;;  %vm377_vm4 = vcmask 523264   ;;  %vm359_vm5 = vcmask 777216   ;;  %vm386_vm6 = vcmask 515072  }
  0x21   : > { %vm405_vm7 = vcmask 1043456   ;;  %vm410_vm8 = vcmask 1045504   ;;  %v706_v56 = vld.sshfl [vmem:[%s947_s13] sm:$0x33 pattern:$0x76325410] }
  0x22   : > { %v304_v8 = vsub.s32 %v301_v6, %v958_v5  ;;  %vm320_vm9 = vcmask 1039360   ;;  %vm339_vm10 = vcmask 1031168   ;;  %v296_v57 = vcombine.high %v706_v56, %v706_v56  ;;  %p709_p12 = scmp.ne.s32.totalorder %s829_s19, 0 }
  0x23   : > { %vm349_vm11 = vcmask 785408   ;;  %vm434_vm12 = vcmask 293888  }
  0x24   : > { %v330_v10 = vrot.slane %v323_v7, %v304_v8  ;;  %v312_v11 = vrot.slane %v287_v1, %v304_v8  ;;  %v305_v12 = vrot.slane %v298_v9, %v304_v8 }
  0x26   : > { %393 = vrot.lane.b32.xlu1 %v330_v10, %s853_s20  ;;  %389 = vrot.lane.b32.xlu0 %v312_v11, %s853_s20  ;;  %v352_v13 = vcombine.high %v312_v11, %v312_v11  ;;  %v313_v14 = vcombine.high %v305_v12, %v305_v12  ;;  %v332_v15 = vcombine.low %v330_v10, %v330_v10 }
  0x27   : > { %v331_v16 = vcombine.low %v312_v11, %v312_v11  ;;  %v342_v17 = vcombine.low %v305_v12, %v305_v12 }
  0x2a   : > { %357 = vrot.lane.b32.xlu0 %v330_v10, %s854_s28  ;;  %355 = vrot.lane.b32.xlu1 %v352_v13, %s854_s28 }
  0x2e   : > { %391 = vrot.lane.b32.xlu0 %v352_v13, %s853_s20  ;;  %364 = vrot.lane.b32.xlu1 %v313_v14, %s855_s29 }
  0x32   : > { %366 = vrot.lane.b32.xlu0 %v312_v11, %s855_s29  ;;  %353 = vrot.lane.b32.xlu1 %v312_v11, %s854_s28 }
  0x36   : > { %362 = vrot.lane.b32.xlu0 %v305_v12, %s855_s29  ;;  %373 = vrot.lane.b32.xlu1 %v312_v11, %s856_s30 }
  0x3a   : > { %375 = vrot.lane.b32.xlu0 %v332_v15, %s856_s30  ;;  %371 = vrot.lane.b32.xlu1 %v331_v16, %s856_s30 }
  0x3e   : > { %382 = vrot.lane.b32.xlu0 %v305_v12, %s857_s6  ;;  %384 = vrot.lane.b32.xlu1 %v331_v16, %s857_s6 }
  0x42   : > { %380 = vrot.lane.b32.xlu0 %v342_v17, %s857_s6  ;;  %316 = vrot.lane.b32.xlu1 %v313_v14, %s858_s7 }
  0x46   : > { %318 = vrot.lane.b32.xlu0 %v312_v11, %s858_s7  ;;  %314 = vrot.lane.b32.xlu1 %v305_v12, %s858_s7 }
  0x4a   : > { %335 = vrot.lane.b32.xlu0 %v312_v11, %s860_s8  ;;  %337 = vrot.lane.b32.xlu1 %v332_v15, %s860_s8  ;;  %v433_v11 = vld [vmem:[%s1032_s1] sm:$0xf] }
  0x4e   : > { %333 = vrot.lane.b32.xlu0 %v331_v16, %s860_s8  ;;  %345 = vrot.lane.b32.xlu1 %v305_v12, %s861_s9  ;;  %v988_v12 = vld [vmem:[%s1035_s4] sm:$0x3] }
  0x52   : > { %347 = vrot.lane.b32.xlu0 %v331_v16, %s861_s9  ;;  %343 = vrot.lane.b32.xlu1 %v342_v17, %s861_s9 }
  0x98   : > { %v394_v19 = vpop.permute.xlu1 %393  ;;  %v390_v20 = vpop.permute.xlu0 %389 }
  0x9c   : > { %v358_v21 = vpop.permute.xlu0 %357  ;;  %v356_v22 = vpop.permute.xlu1 %355 }
  0x9d   : > { %v361_v36 = vsel %vm359_vm5, %v356_v22, %v358_v21 }
  0xa0   : > { %v392_v23 = vpop.permute.xlu0 %391  ;;  %v365_v24 = vpop.permute.xlu1 %364 }
  0xa1   : > { %v397_v25 = vsel %vm395_vm1, %v392_v23, %v394_v19  ;;  %v396_v26 = vsel %vm395_vm1, %v390_v20, %v392_v23 }
  0xa2   : > { %707 = vmatprep.subr.msk.bf16.mxu0 %vm398_vm2, %v397_v25  ;;  %v439_v27 = vsel %vm398_vm2, %v396_v26, 0 }
  0xa3   : > { %455 = vmatpush1.bf16.msra.mxu0 %v439_v27 }
  0xa4   : > { %v367_v28 = vpop.permute.xlu0 %366  ;;  %v354_v29 = vpop.permute.xlu1 %353 }
  0xa5   : > { %v370_v34 = vsel %vm368_vm3, %v365_v24, %v367_v28  ;;  %v360_v45 = vsel %vm359_vm5, %v354_v29, %v356_v22 }
  0xa6   : > { %v422_v37 = vsel %vm398_vm2, %v361_v36, %v370_v34 }
  0xa8   : > { %v363_v30 = vpop.permute.xlu0 %362  ;;  %v374_v31 = vpop.permute.xlu1 %373 }
  0xa9   : > { %v369_v40 = vsel %vm368_vm3, %v363_v30, %v365_v24 }
  0xaa   : > { %v419_v46 = vsel %vm398_vm2, %v360_v45, %v369_v40 }
  0xac   : > { %v376_v32 = vpop.permute.xlu0 %375  ;;  %v372_v33 = vpop.permute.xlu1 %371 }
  0xad   : > { %v379_v35 = vsel %vm377_vm4, %v374_v31, %v376_v32  ;;  %v378_v43 = vsel %vm377_vm4, %v372_v33, %v374_v31 }
  0xae   : > { %v426_v42 = vsel %vm405_vm7, %v422_v37, %v379_v35  ;;  %v424_v50 = vsel %vm405_vm7, %v419_v46, %v378_v43 }
  0xb0   : > { %v383_v38 = vpop.permute.xlu0 %382  ;;  %v385_v39 = vpop.permute.xlu1 %384 }
  0xb1   : > { %v388_v41 = vsel %vm386_vm6, %v383_v38, %v385_v39 }
  0xb2   : > { %v431_v44 = vsel %vm410_vm8, %v426_v42, %v388_v41 }
  0xb3   : > { %456 = vmatprep.subr.bf16.mxu0 %v431_v44 }
  0xb4   : > { %v381_v47 = vpop.permute.xlu0 %380  ;;  %v317_v48 = vpop.permute.xlu1 %316 }
  0xb5   : > { %v387_v49 = vsel %vm386_vm6, %v381_v47, %v383_v38 }
  0xb6   : > { %v428_v51 = vsel %vm410_vm8, %v424_v50, %v387_v49 }
  0xb7   : > { %457 = vmatpush1.bf16.msra.mxu0 %v428_v51 }
  0xb8   : > { %v319_v52 = vpop.permute.xlu0 %318  ;;  %v315_v53 = vpop.permute.xlu1 %314 }
  0xb9   : > { %v322_v60 = vsel %vm320_vm9, %v317_v48, %v319_v52  ;;  %v321_v61 = vsel %vm320_vm9, %v315_v53, %v317_v48 }
  0xba   : > { %v404_v0 = vsel %vm398_vm2, %v296_v57, %v322_v60  ;;  %v401_v1 = vsel %vm398_vm2, %v706_v56, %v321_v61 }
  0xbc   : > { %v336_v54 = vpop.permute.xlu0 %335  ;;  %v338_v55 = vpop.permute.xlu1 %337 }
  0xbd   : > { %v341_v62 = vsel %vm339_vm10, %v336_v54, %v338_v55 }
  0xbe   : > { %v409_v7 = vsel %vm405_vm7, %v404_v0, %v341_v62 }
  0xc0   : > { %v334_v58 = vpop.permute.xlu0 %333  ;;  %v346_v59 = vpop.permute.xlu1 %345 }
  0xc1   : > { %v340_v63 = vsel %vm339_vm10, %v334_v58, %v336_v54 }
  0xc2   : > { %v407_v8 = vsel %vm405_vm7, %v401_v1, %v340_v63 }
  0xc4   : > { %v348_v2 = vpop.permute.xlu0 %347  ;;  %v344_v3 = vpop.permute.xlu1 %343 }
  0xc5   : > { %v351_v4 = vsel %vm349_vm11, %v346_v59, %v348_v2  ;;  %v350_v6 = vsel %vm349_vm11, %v344_v3, %v346_v59 }
  0xc6   : > { %v415_v9 = vsel %vm410_vm8, %v409_v7, %v351_v4  ;;  %v412_v10 = vsel %vm410_vm8, %v407_v8, %v350_v6 }
  0xc7   : > { %458 = vmatprep.subr.bf16.mxu0 %v415_v9 }
  0xc8   : > { %459 = vmatpush1.bf16.msra.mxu0 %v412_v10 }
  0xcb   : > { %708 = vmatmul.mubr.msk.bf16.vlgmr.msra.gmra.mxu0 %vm434_vm12, %v433_v11 }
 0x18b   : > { %v478_v13 = vpop.f32.mrf.mxu0 }
 0x18d   : > { %v480_v14 = vpop.f32.mrf.mxu0  ;;  %488 = sbr.rel (%p709_p12) target bundleno = 555 (0x22b), region = 48 }
 0x18f   : > { %v482_v15 = vpop.f32.mrf.mxu0 }
 0x191   : > { %v483_v16 = vpop.f32.mrf.mxu0 }
 0x192   : > { %v492_v17 = vsub.s32 0, %v958_v5  ;;  %v496_v18 = vsub.s32 1, %v958_v5  ;;  %v502_v27 = vld [vmem:[#allocation2] sm:$0xff]  ;;  %vm507_vm13 = vcmask 7168   ;;  %v509_v30 = vld [vmem:[#allocation3] sm:$0xff] }
 0x194   : > { %v493_v19 = vrot.slane %v988_v12, %v492_v17  ;;  %v497_v20 = vrot.slane %v988_v12, %v496_v18 }
 0x196   : > { %v500_v21 = vmul.f32 %v493_v19, %v478_v13  ;;  %v501_v22 = vmul.f32 %v497_v20, %v480_v14 }
 0x198   : > { %v503_v23 = vadd.f32 %v501_v22, %v500_v21  ;;  %v510_v24 = vmul.f32 %v500_v21, %v478_v13  ;;  %v511_v25 = vmul.f32 %v501_v22, %v480_v14 }
 0x19a   : > { %504 = vadd.xlane.f32.xlu0 %v503_v23  ;;  %v512_v26 = vadd.f32 %v511_v25, %v510_v24 }
 0x19e   : > { %513 = vadd.xlane.f32.xlu0 %v512_v26 }
 0x223   : > { %v505_v28 = vpop.xlane.xlu0 %504 }
 0x224   : > { %v506_v29 = vadd.f32 %v505_v28, %v502_v27 }
 0x226   : > { %508 = vst.msk [vmem:[#allocation2] sm:$0xff] %vm507_vm13, %v506_v29 }
 0x227   : > { %v514_v31 = vpop.xlane.xlu0 %513 }
 0x228   : > { %v515_v32 = vadd.f32 %v514_v31, %v509_v30 }
 0x22a   : > { %516 = vst.msk [vmem:[#allocation3] sm:$0xff] %vm507_vm13, %v515_v32 }
 0x22b PF: > { %p517_p13 = scmp.eq.s32.totalorder %s825_s18, 1 }
 0x22d   : > { %p518_p0 = pnand %p517_p13, %p277_p7 }
 0x22f   : > { %521 = sbr.rel (%p518_p0) target bundleno = 596 (0x254), region = 52 }
 0x234   : > { %v522_v33 = vld [vmem:[#allocation2] sm:$0xff]  ;;  %v524_v34 = vld [vmem:[#allocation3] sm:$0xff]  ;;  %vm533_vm14 = vcmask 7168  }
 0x235   : > { %v523_v35 = vmul.f32 0.00390625, %v522_v33  ;;  %v525_v36 = vmul.f32 0.00390625, %v524_v34  ;;  %v529_v41 = vld [vmem:[%s1033_s2] sm:$0xff] }
 0x236   : > { %v535_v44 = vld [vmem:[%s1034_s3] sm:$0xff] }
 0x237   : > { %v526_v37 = vmul.f32 %v523_v35, %v523_v35 }
 0x239   : > { %v527_v38 = vsub.f32 %v525_v36, %v526_v37 }
 0x23b   : > { %v528_v39 = vmax.f32 %v527_v38, 0.0 }
 0x23d   : > { %v530_v40 = vadd.f32 1e-05, %v528_v39 }
 0x23f   : > { %787 = vrsqrt.f32 %v530_v40 }
 0x24c   : > { %v788_v42 = vpop.eup %787 }
 0x24d   : > { %v532_v43 = vmul.f32 %v788_v42, %v529_v41 }
 0x24f   : > { %534 = vst.msk [vmem:[#allocation4] sm:$0xff] %vm533_vm14, %v532_v43  ;;  %v536_v45 = vmul.f32 %v532_v43, %v523_v35 }
 0x251   : > { %v537_v46 = vsub.f32 %v535_v44, %v536_v45 }
 0x253   : > { %538 = vst.msk [vmem:[#allocation5] sm:$0xff] %vm533_vm14, %v537_v46 }
 0x254 PF: > { %p710_p1 = scmp.ne.s32.totalorder %s829_s19, 1 }
 0x255   : > { %s863_s19 = smov (!%p710_p1), 1  }
 0x256   : > { %542 = sbr.rel (%p710_p1) target bundleno = 863 (0x35f), region = 56 }
 0x25b   : > { %v543_v47 = vld [vmem:[#allocation4] sm:$0xff]  ;;  %v862_v48 = vmov 0   ;;  %v551_v49 = vld [vmem:[#allocation5] sm:$0xff]  ;;  %v568_v51 = vsub.s32 0, %v958_v5  ;;  %v572_v52 = vsub.s32 1, %v958_v5  ;;  %vm584_vm1 = vcmask 7168  }
 0x25c   : > { %789 = vset.pattern.permute.xlu0 %v862_v48 }
 0x25d   : > { %546 = vperm.xlu0 %789, %v543_v47   ;;  %v569_v58 = vrot.slane %v988_v12, %v568_v51  ;;  %v573_v59 = vrot.slane %v988_v12, %v572_v52 }
 0x261   : > { %554 = vperm.xlu0 %789, %v551_v49  }
 0x2d8   : > { %v547_v50 = vpop.permute.xlu0 %546 }
 0x2d9   : > { %v549_v53 = vmul.f32 %v547_v50, %v478_v13  ;;  %v550_v54 = vmul.f32 %v547_v50, %v480_v14 }
 0x2dc   : > { %v555_v55 = vpop.permute.xlu0 %554 }
 0x2dd   : > { %v557_v56 = vadd.f32 %v555_v55, %v549_v53  ;;  %v558_v57 = vadd.f32 %v555_v55, %v550_v54 }
 0x2df   : > { %vm559_vm15 = vcmp.ge.f32.partialorder %v557_v56, 0.0  ;;  %vm560_vm0 = vcmp.ge.f32.partialorder %v558_v57, 0.0  ;;  %v561_v60 = vmul.f32 0.01, %v557_v56  ;;  %v562_v61 = vmul.f32 0.01, %v558_v57 }
 0x2e1   : > { %v563_v62 = vsel %vm559_vm15, %v557_v56, %v561_v60  ;;  %v564_v63 = vsel %vm560_vm0, %v558_v57, %v562_v61 }
 0x2e2   : > { %v576_v0 = vmul.f32 %v569_v58, %v563_v62  ;;  %v577_v1 = vmul.f32 %v573_v59, %v564_v63 }
 0x2e4   : > { %v790_v2 = vpack.i.bf16 %v577_v1, %v576_v0 }
 0x2e6   : > { %791 = vrot.lane.b32.xlu1 %v790_v2, %s863_s19 }
 0x358   : > { %v792_v5 = vpop.permute.xlu1 %791 }
 0x359   : > { %v794_v3 = vunpack.i.h.bf16 %v792_v5  ;;  %v793_v4 = vunpack.i.l.bf16 %v792_v5 }
 0x35b   : > { %v585_v6 = vsel %vm584_vm1, %v793_v4, %v794_v3  ;;  %v588_v7 = vsel %vm584_vm1, 0.0, %v793_v4 }
 0x35c   : > { %v714_v8 = vpack.c.bf16 %v585_v6, %v588_v7 }
 0x35e   : > { %597 = vst [vmem:[%s952_s17] sm:$0xff] %v714_v8 }
 0x35f PF: > { %s15_s24 = sadd.s32 1, %s849_s24   ;;  %s1037_s18 = smov %s837_s21 }
 0x360   : > { %p12_p2 = scmp.ge.s32.totalorder %s15_s24, 10   ;;  %s1038_s19 = smov %s841_s22 }
 0x361   : > { %s1039_s20 = smov %s845_s23  ;;  %s1040_s21 = smov %s1044_s25 }
 0x362   : > { %s1041_s22 = smov %s1048_s26  ;;  %s1042_s23 = smov %s1052_s27 }
 0x363   :  { %14 = sbr.rel (!%p12_p2) target bundleno = 4 (0x4), region = 86 }

// kernel: stacked_conv_blocks2.3
= control target key start
LH: loop header
LB: loop body
LE: loop exit
PB: predicated region body
PF: predicated region fallthrough
CT: control target
= control target key end

     0   :  { %s871_s18 = smov 0   ;;  %s873_s19 = smov 0   ;;  %s1019_s0 = inlined_call_operand.vmem [shape: bf16[2,8,768], index: 0, kind: input, shape index: {}]   ;;  %s1020_s1 = inlined_call_operand.vmem [shape: bf16[8,72], index: 1, kind: input, shape index: {}]   ;;  %s1021_s2 = inlined_call_operand.vmem [shape: f32[8,1], index: 2, kind: input, shape index: {}]   ;;  %s1022_s3 = inlined_call_operand.vmem [shape: f32[8,1], index: 3, kind: input, shape index: {}]   ;;  %s1023_s4 = inlined_call_operand.vmem [shape: f32[1,256], index: 4, kind: input, shape index: {}]   ;;  %s1024_s5 = inlined_call_operand.vmem [shape: bf16[2,8,512], index: 5, kind: output, shape index: {}]  }
   0x1   :  { %s875_s20 = smov 0   ;;  %s877_s21 = smov 0  }
   0x2   :  { %s879_s22 = smov 0   ;;  %s881_s23 = smov 0  }
   0x3   :  { %s883_s24 = smov 0  }
   0x4 LB: > { %s27_s25 = sadd.s32 1, %s815_s21  ;;  %s30_s26 = sadd.s32 1, %s819_s22  ;;  %s827_s24 = sphi %s883_s24, %s15_s24   ;;  %s823_s23 = sphi %s881_s23, %s1030_s23   ;;  %s819_s22 = sphi %s879_s22, %s1029_s22   ;;  %s815_s21 = sphi %s877_s21, %s1028_s21   ;;  %s811_s20 = sphi %s875_s20, %s1027_s20   ;;  %s807_s19 = sphi %s873_s19, %s1026_s19   ;;  %s803_s18 = sphi %s871_s18, %s1025_s18  }
   0x5   : > { %p28_p0 = scmp.ge.s32.totalorder %s27_s25, 2  ;;  %p675_p1 = scmp.ge.s32.totalorder %s827_s24, 1 }
   0x6   : > { %p217_p2 = scmp.lt.s32.totalorder %s827_s24, 9  ;;  %s34_s27 = sadd.s32 1, %s823_s23 }
   0x7   : > { %s1032_s25 = smov (%p28_p0, %s27_s25), 0  ;;  %s1034_s26 = smov (!%p28_p0, %s30_s26), %s819_s22 }
   0x8   : > { %p218_p3 = pnand %p675_p1, %p217_p2  ;;  %p32_p4 = scmp.ge.s32.totalorder %s1034_s26, 2 }
   0x9   : > { %s254_s28 = smul.u32 (!%p218_p3), 3, %s803_s18  ;;  %p255_p6 = scmp.lt.s32.totalorder (!%p218_p3), %s811_s20, 1 }
   0xa   : > { %s1036_s26 = smov (%p32_p4, %s1034_s26), 0  ;;  %s1038_s27 = smov (!%p32_p4, %s34_s27), %s823_s23 }
   0xb   : > { %p36_p5 = scmp.ge.s32.totalorder %s1038_s27, 2  ;;  %221 = sbr.rel (%p218_p3) target bundleno = 861 (0x35d), region = 40 }
   0xc   : > { %s264_s29 = smul.u32 (!%p218_p3), %s803_s18, %s807_s19  ;;  %p277_p7 = scmp.eq.s32.totalorder (!%p218_p3), %s807_s19, 0 }
   0xd   : > { %s1040_s27 = smov (%p36_p5, %s1038_s27), 0  ;;  %p257_p8 = scmp.lt.s32.totalorder (!%p218_p3), %s254_s28, 5 }
   0xe   : > { %s677_s30 = sshll.u32 (!%p218_p3), %s264_s29, 1  ;;  %p278_p10 = scmp.eq.s32.totalorder (!%p218_p3), %s803_s18, 0 }
   0xf   : > { %p268_p9 = scmp.lt.s32.totalorder (!%p218_p3), %s677_s30, 3 }
  0x10   : > { %s1042_s20 = smov (!%p255_p6, %s811_s20), 1  ;;  %s1044_s28 = smov (!%p257_p8, %s254_s28), 5 }
  0x11   : > { %s693_s6 = smul.u32 6, %s1042_s20  ;;  %s1046_s30 = smov (!%p268_p9, %s677_s30), 3 }
  0x12   : > { %s678_s8 = sshll.u32 %s1042_s20, 2  ;;  %p279_p11 = pnand %p278_p10, %p277_p7 }
  0x13   : > { %s260_s7 = sadd.s32 %s693_s6, %s1044_s28  ;;  %s271_s10 = sadd.s32 %s678_s8, %s1046_s30 }
  0x14   : > { %s676_s9 = sshll.u32 %s260_s7, 2  ;;  %s679_s14 = sshll.u32 %s271_s10, 2 }
  0x15   : > { %s262_s13 = scalar_lea.vmem %s1019_s0, %s676_s9  ;;  %s927_s17 = scalar_lea.vmem %s1024_s5, %s679_s14 }
  0x16   : > { %282 = sbr.rel (%p279_p11) target bundleno = 29 (0x1d), region = 44 }
  0x1b   : > { %vm283_vm0 = vcmask 7168   ;;  %v829_v0 = vmov 0.0  }
  0x1c   : > { %284 = vst.msk [vmem:[#allocation2] sm:$0xff] %vm283_vm0, %v829_v0  ;;  %285 = vst.msk [vmem:[#allocation3] sm:$0xff] %vm283_vm0, %v829_v0 }
  0x1d PF: > { %v762_v1 = vld [vmem:[%s262_s13 + $0x8] ss:$0 sps:$4 sm:$0xff]   ;;  %v287_v2 = vld [vmem:[%s262_s13] sm:$0xff]  ;;  %s830_s20 = smov 62   ;;  %s831_s28 = smov 64   ;;  %v837_v5 = vmov 0  }
  0x1e   : > { %v932_v3 = vcombine.low %v287_v2, %v287_v2  ;;  %369 = vrot.lane.b32.xlu1 %v762_v1, %s830_s20  ;;  %v934_v4 = vcombine.high %v287_v2, %v287_v2  ;;  %s832_s29 = smov 63   ;;  %s833_s30 = smov 95   ;;  %450 = vmatprep.mubr.bf16.mxu0 %v837_v5  ;;  %vm371_vm1 = vcmask 506880   ;;  %vm374_vm2 = vcmask 1043456   ;;  %v407_v55 = vld [vmem:[%s1020_s1] sm:$0xf] }
  0x1f   : > { %s834_s6 = smov 94   ;;  %s835_s7 = smov 126   ;;  %vm353_vm3 = vcmask 523264   ;;  %vm362_vm4 = vcmask 515072   ;;  %vm335_vm5 = vcmask 777216   ;;  %vm344_vm6 = vcmask 769024  }
  0x20   : > { %365 = vrot.lane.b32.xlu0 %v932_v3, %s830_s20  ;;  %s836_s8 = smov 96   ;;  %s838_s9 = smov 127   ;;  %vm317_vm7 = vcmask 1031168   ;;  %vm326_vm8 = vcmask 785408   ;;  %vm308_vm9 = vcmask 1039360   ;;  %vm408_vm10 = vcmask 588800  }
  0x21   : > { %v970_v56 = vld [vmem:[%s1023_s4] sm:$0x3]  ;;  %p687_p12 = scmp.ne.s32.totalorder %s807_s19, 0 }
  0x22   : > { %349 = vrot.lane.b32.xlu1 %v934_v4, %s831_s28 }
  0x24   : > { %367 = vrot.lane.b32.xlu0 %v934_v4, %s830_s20 }
  0x26   : > { %358 = vrot.lane.b32.xlu1 %v934_v4, %s832_s29 }
  0x28   : > { %351 = vrot.lane.b32.xlu0 %v762_v1, %s831_s28 }
  0x2a   : > { %347 = vrot.lane.b32.xlu1 %v932_v3, %s831_s28 }
  0x2c   : > { %360 = vrot.lane.b32.xlu0 %v762_v1, %s832_s29 }
  0x2e   : > { %331 = vrot.lane.b32.xlu1 %v934_v4, %s833_s30 }
  0x30   : > { %356 = vrot.lane.b32.xlu0 %v932_v3, %s832_s29 }
  0x32   : > { %340 = vrot.lane.b32.xlu1 %v934_v4, %s834_s6 }
  0x34   : > { %333 = vrot.lane.b32.xlu0 %v762_v1, %s833_s30 }
  0x36   : > { %329 = vrot.lane.b32.xlu1 %v932_v3, %s833_s30 }
  0x38   : > { %342 = vrot.lane.b32.xlu0 %v762_v1, %s834_s6 }
  0x3a   : > { %313 = vrot.lane.b32.xlu1 %v934_v4, %s835_s7 }
  0x3c   : > { %338 = vrot.lane.b32.xlu0 %v932_v3, %s834_s6 }
  0x3e   : > { %322 = vrot.lane.b32.xlu1 %v934_v4, %s836_s8 }
  0x40   : > { %315 = vrot.lane.b32.xlu0 %v762_v1, %s835_s7 }
  0x42   : > { %311 = vrot.lane.b32.xlu1 %v932_v3, %s835_s7 }
  0x44   : > { %324 = vrot.lane.b32.xlu0 %v762_v1, %s836_s8 }
  0x46   : > { %304 = vrot.lane.b32.xlu1 %v934_v4, %s838_s9 }
  0x48   : > { %320 = vrot.lane.b32.xlu0 %v932_v3, %s836_s8 }
  0x4a   : > { %302 = vrot.lane.b32.xlu1 %v932_v3, %s838_s9 }
  0x4c   : > { %306 = vrot.lane.b32.xlu0 %v762_v1, %s838_s9 }
  0x90   : > { %v370_v6 = vpop.permute.xlu1 %369 }
  0x92   : > { %v366_v7 = vpop.permute.xlu0 %365 }
  0x94   : > { %v350_v8 = vpop.permute.xlu1 %349 }
  0x96   : > { %v368_v9 = vpop.permute.xlu0 %367 }
  0x97   : > { %v373_v10 = vsel %vm371_vm1, %v368_v9, %v370_v6  ;;  %v372_v11 = vsel %vm371_vm1, %v366_v7, %v368_v9 }
  0x98   : > { %685 = vmatprep.subr.msk.bf16.mxu0 %vm374_vm2, %v373_v10  ;;  %v413_v12 = vsel %vm374_vm2, %v372_v11, 0  ;;  %v359_v13 = vpop.permute.xlu1 %358 }
  0x99   : > { %425 = vmatpush1.bf16.msra.mxu0 %v413_v12 }
  0x9a   : > { %v352_v14 = vpop.permute.xlu0 %351 }
  0x9b   : > { %v355_v17 = vsel %vm353_vm3, %v350_v8, %v352_v14 }
  0x9c   : > { %v348_v15 = vpop.permute.xlu1 %347 }
  0x9d   : > { %v354_v22 = vsel %vm353_vm3, %v348_v15, %v350_v8 }
  0x9e   : > { %v361_v16 = vpop.permute.xlu0 %360 }
  0x9f   : > { %v364_v18 = vsel %vm362_vm4, %v359_v13, %v361_v16 }
  0xa0   : > { %v405_v19 = vsel %vm374_vm2, %v355_v17, %v364_v18  ;;  %v332_v20 = vpop.permute.xlu1 %331 }
  0xa1   : > { %426 = vmatprep.subr.bf16.mxu0 %v405_v19 }
  0xa2   : > { %v357_v21 = vpop.permute.xlu0 %356 }
  0xa3   : > { %v363_v23 = vsel %vm362_vm4, %v357_v21, %v359_v13 }
  0xa4   : > { %v401_v24 = vsel %vm374_vm2, %v354_v22, %v363_v23  ;;  %v341_v25 = vpop.permute.xlu1 %340 }
  0xa5   : > { %427 = vmatpush1.bf16.msra.mxu0 %v401_v24 }
  0xa6   : > { %v334_v26 = vpop.permute.xlu0 %333 }
  0xa7   : > { %v337_v29 = vsel %vm335_vm5, %v332_v20, %v334_v26 }
  0xa8   : > { %v330_v27 = vpop.permute.xlu1 %329 }
  0xa9   : > { %v336_v34 = vsel %vm335_vm5, %v330_v27, %v332_v20 }
  0xaa   : > { %v343_v28 = vpop.permute.xlu0 %342 }
  0xab   : > { %v346_v30 = vsel %vm344_vm6, %v341_v25, %v343_v28 }
  0xac   : > { %v397_v31 = vsel %vm374_vm2, %v337_v29, %v346_v30  ;;  %v314_v32 = vpop.permute.xlu1 %313 }
  0xad   : > { %428 = vmatprep.subr.bf16.mxu0 %v397_v31 }
  0xae   : > { %v339_v33 = vpop.permute.xlu0 %338 }
  0xaf   : > { %v345_v35 = vsel %vm344_vm6, %v339_v33, %v341_v25 }
  0xb0   : > { %v393_v36 = vsel %vm374_vm2, %v336_v34, %v345_v35  ;;  %v323_v37 = vpop.permute.xlu1 %322 }
  0xb1   : > { %429 = vmatpush1.bf16.msra.mxu0 %v393_v36 }
  0xb2   : > { %v316_v38 = vpop.permute.xlu0 %315 }
  0xb3   : > { %v319_v41 = vsel %vm317_vm7, %v314_v32, %v316_v38 }
  0xb4   : > { %v312_v39 = vpop.permute.xlu1 %311 }
  0xb5   : > { %v318_v46 = vsel %vm317_vm7, %v312_v39, %v314_v32 }
  0xb6   : > { %v325_v40 = vpop.permute.xlu0 %324 }
  0xb7   : > { %v328_v42 = vsel %vm326_vm8, %v323_v37, %v325_v40 }
  0xb8   : > { %v389_v43 = vsel %vm374_vm2, %v319_v41, %v328_v42  ;;  %v305_v44 = vpop.permute.xlu1 %304 }
  0xb9   : > { %430 = vmatprep.subr.bf16.mxu0 %v389_v43 }
  0xba   : > { %v321_v45 = vpop.permute.xlu0 %320 }
  0xbb   : > { %v327_v47 = vsel %vm326_vm8, %v321_v45, %v323_v37 }
  0xbc   : > { %v385_v48 = vsel %vm374_vm2, %v318_v46, %v327_v47  ;;  %v303_v49 = vpop.permute.xlu1 %302 }
  0xbd   : > { %431 = vmatpush1.bf16.msra.mxu0 %v385_v48  ;;  %v309_v50 = vsel %vm308_vm9, %v303_v49, %v305_v44 }
  0xbe   : > { %v307_v51 = vpop.permute.xlu0 %306  ;;  %v377_v54 = vsel %vm374_vm2, %v932_v3, %v309_v50 }
  0xbf   : > { %v310_v52 = vsel %vm308_vm9, %v305_v44, %v307_v51 }
  0xc0   : > { %v381_v53 = vsel %vm374_vm2, %v934_v4, %v310_v52 }
  0xc1   : > { %432 = vmatprep.subr.bf16.mxu0 %v381_v53 }
  0xc2   : > { %433 = vmatpush1.bf16.msra.mxu0 %v377_v54 }
  0xc5   : > { %686 = vmatmul.mubr.msk.bf16.vlgmr.msra.gmra.mxu0 %vm408_vm10, %v407_v55 }
 0x185   : > { %v972_v57 = vpop.f32.mrf.mxu0 }
 0x187   : > { %v974_v58 = vpop.f32.mrf.mxu0  ;;  %462 = sbr.rel (%p687_p12) target bundleno = 553 (0x229), region = 48 }
 0x189   : > { %v456_v59 = vpop.f32.mrf.mxu0 }
 0x18b   : > { %v457_v60 = vpop.f32.mrf.mxu0 }
 0x18c   : > { %v464_v61 = vlaneseq  ;;  %v476_v9 = vld [vmem:[#allocation2] sm:$0xff]  ;;  %vm481_vm11 = vcmask 7168   ;;  %v483_v12 = vld [vmem:[#allocation3] sm:$0xff] }
 0x18e   : > { %v465_v62 = vshrl.u32 %v464_v61, 7 }
 0x190   : > { %v466_v63 = vsub.s32 0, %v465_v62  ;;  %v470_v0 = vsub.s32 1, %v465_v62 }
 0x192   : > { %v467_v1 = vrot.slane %v970_v56, %v466_v63  ;;  %v471_v2 = vrot.slane %v970_v56, %v470_v0 }
 0x194   : > { %v474_v3 = vmul.f32 %v467_v1, %v972_v57  ;;  %v475_v4 = vmul.f32 %v471_v2, %v974_v58 }
 0x196   : > { %v477_v5 = vadd.f32 %v475_v4, %v474_v3  ;;  %v484_v6 = vmul.f32 %v474_v3, %v972_v57  ;;  %v485_v7 = vmul.f32 %v475_v4, %v974_v58 }
 0x198   : > { %478 = vadd.xlane.f32.xlu0 %v477_v5  ;;  %v486_v8 = vadd.f32 %v485_v7, %v484_v6 }
 0x19c   : > { %487 = vadd.xlane.f32.xlu0 %v486_v8 }
 0x221   : > { %v479_v10 = vpop.xlane.xlu0 %478 }
 0x222   : > { %v480_v11 = vadd.f32 %v479_v10, %v476_v9 }
 0x224   : > { %482 = vst.msk [vmem:[#allocation2] sm:$0xff] %vm481_vm11, %v480_v11 }
 0x225   : > { %v488_v13 = vpop.xlane.xlu0 %487 }
 0x226   : > { %v489_v14 = vadd.f32 %v488_v13, %v483_v12 }
 0x228   : > { %490 = vst.msk [vmem:[#allocation3] sm:$0xff] %vm481_vm11, %v489_v14 }
 0x229 PF: > { %p491_p13 = scmp.eq.s32.totalorder %s803_s18, 1 }
 0x22b   : > { %p492_p0 = pnand %p491_p13, %p277_p7 }
 0x22d   : > { %495 = sbr.rel (%p492_p0) target bundleno = 594 (0x252), region = 52 }
 0x232   : > { %v496_v15 = vld [vmem:[#allocation2] sm:$0xff]  ;;  %v498_v16 = vld [vmem:[#allocation3] sm:$0xff]  ;;  %vm507_vm12 = vcmask 7168  }
 0x233   : > { %v497_v17 = vmul.f32 0.00390625, %v496_v15  ;;  %v499_v18 = vmul.f32 0.00390625, %v498_v16  ;;  %v503_v23 = vld [vmem:[%s1021_s2] sm:$0xff] }
 0x234   : > { %v509_v26 = vld [vmem:[%s1022_s3] sm:$0xff] }
 0x235   : > { %v500_v19 = vmul.f32 %v497_v17, %v497_v17 }
 0x237   : > { %v501_v20 = vsub.f32 %v499_v18, %v500_v19 }
 0x239   : > { %v502_v21 = vmax.f32 %v501_v20, 0.0 }
 0x23b   : > { %v504_v22 = vadd.f32 1e-05, %v502_v21 }
 0x23d   : > { %765 = vrsqrt.f32 %v504_v22 }
 0x24a   : > { %v766_v24 = vpop.eup %765 }
 0x24b   : > { %v506_v25 = vmul.f32 %v766_v24, %v503_v23 }
 0x24d   : > { %508 = vst.msk [vmem:[#allocation4] sm:$0xff] %vm507_vm12, %v506_v25  ;;  %v510_v27 = vmul.f32 %v506_v25, %v497_v17 }
 0x24f   : > { %v511_v28 = vsub.f32 %v509_v26, %v510_v27 }
 0x251   : > { %512 = vst.msk [vmem:[#allocation5] sm:$0xff] %vm507_vm12, %v511_v28 }
 0x252 PF: > { %p688_p1 = scmp.ne.s32.totalorder %s807_s19, 1 }
 0x253   : > { %s840_s19 = smov (!%p688_p1), 1  }
 0x254   : > { %516 = sbr.rel (%p688_p1) target bundleno = 861 (0x35d), region = 56 }
 0x259   : > { %v517_v29 = vld [vmem:[#allocation4] sm:$0xff]  ;;  %v839_v30 = vmov 0   ;;  %v525_v31 = vld [vmem:[#allocation5] sm:$0xff]  ;;  %v540_v32 = vlaneseq  ;;  %vm558_vm15 = vcmask 7168  }
 0x25a   : > { %767 = vset.pattern.permute.xlu0 %v839_v30 }
 0x25b   : > { %520 = vperm.xlu0 %767, %v517_v29   ;;  %v541_v33 = vshrl.u32 %v540_v32, 7 }
 0x25d   : > { %v542_v35 = vsub.s32 0, %v541_v33  ;;  %v546_v36 = vsub.s32 1, %v541_v33 }
 0x25f   : > { %528 = vperm.xlu0 %767, %v525_v31   ;;  %v543_v42 = vrot.slane %v970_v56, %v542_v35  ;;  %v547_v43 = vrot.slane %v970_v56, %v546_v36 }
 0x2d6   : > { %v521_v34 = vpop.permute.xlu0 %520 }
 0x2d7   : > { %v523_v37 = vmul.f32 %v521_v34, %v972_v57  ;;  %v524_v38 = vmul.f32 %v521_v34, %v974_v58 }
 0x2da   : > { %v529_v39 = vpop.permute.xlu0 %528 }
 0x2db   : > { %v531_v40 = vadd.f32 %v529_v39, %v523_v37  ;;  %v532_v41 = vadd.f32 %v529_v39, %v524_v38 }
 0x2dd   : > { %vm533_vm13 = vcmp.ge.f32.partialorder %v531_v40, 0.0  ;;  %vm534_vm14 = vcmp.ge.f32.partialorder %v532_v41, 0.0  ;;  %v535_v44 = vmul.f32 0.01, %v531_v40  ;;  %v536_v45 = vmul.f32 0.01, %v532_v41 }
 0x2df   : > { %v537_v46 = vsel %vm533_vm13, %v531_v40, %v535_v44  ;;  %v538_v47 = vsel %vm534_vm14, %v532_v41, %v536_v45 }
 0x2e0   : > { %v550_v48 = vmul.f32 %v543_v42, %v537_v46  ;;  %v551_v49 = vmul.f32 %v547_v43, %v538_v47 }
 0x2e2   : > { %v768_v50 = vpack.i.bf16 %v551_v49, %v550_v48 }
 0x2e4   : > { %769 = vrot.lane.b32.xlu1 %v768_v50, %s840_s19 }
 0x356   : > { %v770_v51 = vpop.permute.xlu1 %769 }
 0x357   : > { %v772_v52 = vunpack.i.h.bf16 %v770_v51  ;;  %v771_v53 = vunpack.i.l.bf16 %v770_v51 }
 0x359   : > { %v559_v54 = vsel %vm558_vm15, %v771_v53, %v772_v52  ;;  %v562_v55 = vsel %vm558_vm15, 0.0, %v771_v53 }
 0x35a   : > { %v692_v57 = vpack.c.bf16 %v559_v54, %v562_v55 }
 0x35c   : > { %571 = vst [vmem:[%s927_s17] sm:$0xff] %v692_v57 }
 0x35d PF: > { %s15_s24 = sadd.s32 1, %s827_s24   ;;  %s1025_s18 = smov %s815_s21 }
 0x35e   : > { %p12_p2 = scmp.ge.s32.totalorder %s15_s24, 10   ;;  %s1026_s19 = smov %s819_s22 }
 0x35f   : > { %s1027_s20 = smov %s823_s23  ;;  %s1028_s21 = smov %s1032_s25 }
 0x360   : > { %s1029_s22 = smov %s1036_s26  ;;  %s1030_s23 = smov %s1040_s27 }
 0x361   :  { %14 = sbr.rel (!%p12_p2) target bundleno = 4 (0x4), region = 86 }

</bundles_post_ra>
